<compile_context>
chip_gen: v7x
topology: tpu7x:2x2x1
jax: 0.10.0
libtpu: 0.0.40
codegen_flags: <defaults>
</compile_context>

<pallas_src>
import functools
import math

import jax
import jax.numpy as jnp
from jax import lax
from jax.experimental import pallas as pl
from jax.experimental.pallas import tpu as pltpu


_VMEM = pl.BlockSpec(memory_space=pltpu.MemorySpace.VMEM)
_LANE = 128       # pad linear-head output dims to a multiple of this (dense stores)
_SUBLANE = 8      # pad batch to a multiple of this (aligned vreg row tiles)
_MM_DTYPE = jnp.bfloat16   # MXU operand dtype (f32 accumulate); f32xf32 is slow emulation


def _nbytes(a):
    return math.prod(a.shape) * jnp.dtype(a.dtype).itemsize


def _vmem_limit_bytes(total_bytes):
    """Scoped-VMEM limit sized to the actual footprint (+headroom).

    Defaults (16 MiB v5e / 32 MiB v6e,v7x) are hit long before physical capacity on non-toy
    shapes.  Capped at 64 MiB so the same value is legal on v7x as well as v5e/v6e.
    """
    return max(min(int(1.25 * total_bytes) + (2 << 20), 64 << 20), 16 << 20)


# ---------------------------------------------------------------------------
# Pallas kernels
# ---------------------------------------------------------------------------

def _bilstm_tagger_kernel(x_ref, wih_ref, whh_ref, b_ref, *rest,
                          seq_len, b_pad, hidden, with_head):
    """Fused bidirectional LSTM (+ optional ReLU -> Linear tagger head).

    x_ref:      (T*Bp, D)    input, rows grouped per time step (time-major).
    wih_ref:    (D, 8H)      bf16 [fwd | bwd] input->gate weights, gate order (i,f,o,g).
    whh_ref:    (2H, 8H)     bf16 block-diagonal [fwd | bwd] hidden->gate weights.
    b_ref:      (1, 8H)      f32 folded b_ih + b_hh for both directions.
    with_head:  wtag_ref (2H, P) bf16 lane-padded, btag_ref (1, P) f32, tag_ref (T*Bp, P) out.
    states_ref: (T*Bp, 2H)   out[t*Bp + b] = [h_fwd(t,b) | h_bwd(t,b)]  (PyTorch layout).
    xg_scr:     (T*Bp, 8H)   hoisted input projection scratch.
    """
    if with_head:
        wtag_ref, btag_ref, states_ref, tag_ref, xg_scr = rest
    else:
        states_ref, xg_scr = rest
        wtag_ref = btag_ref = tag_ref = None
    T, Bp, H = seq_len, b_pad, hidden
    mm = wih_ref.dtype

    # 1) Hoisted input projection: one big bf16 MXU matmul (f32 accumulate), bias folded in.
    xg_scr[...] = (
        jnp.dot(x_ref[...].astype(mm), wih_ref[...],
                preferred_element_type=jnp.float32)
        + b_ref[...])

    whh = whh_ref[...]            # (2H, 8H) block-diagonal; vreg-resident for all steps

    # 2) Recurrence: h/c are fori_loop carries (vregs, no VMEM round-trips on the serial
    #    chain).  fwd processes time s, bwd time T-1-s, sharing one block-diagonal
    #    hidden->gate matmul per step; h is written straight into states_ref.
    def step(s, carry):
        h, c = carry                                            # (Bp, 2H) f32  [fwd | bwd]
        row_f = pl.multiple_of(s * Bp, Bp)
        row_b = pl.multiple_of((T - 1 - s) * Bp, Bp)
        gx_f = xg_scr[pl.ds(row_f, Bp), pl.ds(0, 4 * H)]        # ref-sliced: no (Bp,8H) temp
        gx_b = xg_scr[pl.ds(row_b, Bp), pl.ds(4 * H, 4 * H)]

        gh = jnp.dot(h.astype(mm), whh, preferred_element_type=jnp.float32)   # (Bp, 8H)
        gates_f = gx_f + gh[:, 0:4 * H]
        gates_b = gx_b + gh[:, 4 * H:8 * H]

        # gate order (i, f, o, g): one sigmoid over 3H + one tanh over H per direction.
        sf = jax.nn.sigmoid(gates_f[:, 0:3 * H])
        sb = jax.nn.sigmoid(gates_b[:, 0:3 * H])
        g_f = jnp.tanh(gates_f[:, 3 * H:4 * H])
        g_b = jnp.tanh(gates_b[:, 3 * H:4 * H])

        c_f = sf[:, H:2 * H] * c[:, 0:H] + sf[:, 0:H] * g_f
        c_b = sb[:, H:2 * H] * c[:, H:2 * H] + sb[:, 0:H] * g_b
        c_new = jnp.concatenate([c_f, c_b], axis=1)
        tc = jnp.tanh(c_new)
        h_f = sf[:, 2 * H:3 * H] * tc[:, 0:H]
        h_b = sb[:, 2 * H:3 * H] * tc[:, H:2 * H]

        states_ref[pl.ds(row_f, Bp), pl.ds(0, H)] = h_f
        states_ref[pl.ds(row_b, Bp), pl.ds(H, H)] = h_b
        return jnp.concatenate([h_f, h_b], axis=1), c_new

    init = (jnp.zeros((Bp, 2 * H), jnp.float32), jnp.zeros((Bp, 2 * H), jnp.float32))
    # Full unroll only for short T; partial unroll avoids the vreg-spill cliff at large T.
    lax.fori_loop(0, T, step, init, unroll=True if T <= 16 else 4)

    # 3) Fused ReLU -> Linear tagger head epilogue (only when the caller uses it).
    if with_head:
        acts = jnp.maximum(states_ref[...], 0.0)    # dropout is identity in eval mode
        tag_ref[...] = (
            jnp.dot(acts.astype(mm), wtag_ref[...],
                    preferred_element_type=jnp.float32)
            + btag_ref[...])


def _linear_kernel(x_ref, w_ref, b_ref, o_ref):
    """y = x @ W + b ; x:(N,Din) f32, W:(Din,Dpad) bf16 lane-padded, b:(1,Dpad) f32."""
    o_ref[...] = (jnp.dot(x_ref[...].astype(w_ref.dtype), w_ref[...],
                          preferred_element_type=jnp.float32) + b_ref[...])


# ---------------------------------------------------------------------------
# Wrappers around pallas_call
# ---------------------------------------------------------------------------

def lstm_tagger_flat(x2d, lstm_p, tag_p, seq_len, b_pad, *, with_head):
    """One LSTMTagger on flat (T*Bp, Din) input.

    with_head=True  -> (states (T*Bp, 2H), tagged (T*Bp, P))
    with_head=False -> states (T*Bp, 2H)   (POS head skipped entirely)
    """
    n = seq_len * b_pad
    H = lstm_p["whh"].shape[0] // 2
    args = [x2d, lstm_p["wih"], lstm_p["whh"], lstm_p["b"]]
    states = jax.ShapeDtypeStruct((n, 2 * H), jnp.float32)
    if with_head:
        args += [tag_p["wt"], tag_p["b"]]
        out_shape = (states, jax.ShapeDtypeStruct((n, tag_p["wt"].shape[1]), jnp.float32))
        out_specs = (_VMEM, _VMEM)
        outs = out_shape
    else:
        out_shape = states
        out_specs = _VMEM
        outs = (states,)

    scratch_bytes = n * 8 * H * 4                       # hoisted input projection (f32)
    footprint = (sum(_nbytes(a) for a in args)
                 + sum(_nbytes(o) for o in outs) + scratch_bytes)

    return pl.pallas_call(
        functools.partial(_bilstm_tagger_kernel, seq_len=seq_len, b_pad=b_pad,
                          hidden=H, with_head=with_head),
        out_shape=out_shape,
        in_specs=[_VMEM] * len(args),
        out_specs=out_specs,
        scratch_shapes=[pltpu.VMEM((n, 8 * H), jnp.float32)],
        compiler_params=pltpu.CompilerParams(
            vmem_limit_bytes=_vmem_limit_bytes(footprint)),
    )(*args)


def linear_flat(x2d, lp):
    """x2d:(N,Din) -> (N, Dpad); caller slices off the lane padding."""
    n = x2d.shape[0]
    d_pad = lp["wt"].shape[1]
    out = jax.ShapeDtypeStruct((n, d_pad), jnp.float32)
    footprint = _nbytes(x2d) + _nbytes(lp["wt"]) + _nbytes(lp["b"]) + _nbytes(out)
    return pl.pallas_call(
        _linear_kernel,
        out_shape=out,
        in_specs=[_VMEM] * 3,
        out_specs=_VMEM,
        compiler_params=pltpu.CompilerParams(
            vmem_limit_bytes=_vmem_limit_bytes(footprint)),
    )(x2d, lp["wt"], lp["b"])


# ---------------------------------------------------------------------------
# Parameters: PyTorch-layout init + one-time kernel-ready preparation
# ---------------------------------------------------------------------------

def init_params(key, input_dim, hidden_dim, n_pos, n_tag, subtask):
    """Raw parameters in PyTorch nn.LSTM / nn.Linear layout (f32)."""
    H = hidden_dim // 2
    keys = iter(jax.random.split(key, 64))

    def u(shape, scale):
        return jax.random.uniform(next(keys), shape, jnp.float32, -scale, scale)

    def lstm_params(d_in, h):
        s = 1.0 / (h ** 0.5)
        return {
            "w_ih_f": u((4 * h, d_in), s), "w_hh_f": u((4 * h, h), s),
            "b_ih_f": u((4 * h,), s),      "b_hh_f": u((4 * h,), s),
            "w_ih_b": u((4 * h, d_in), s), "w_hh_b": u((4 * h, h), s),
            "b_ih_b": u((4 * h,), s),      "b_hh_b": u((4 * h,), s),
        }

    def linear_params(d_in, d_out):
        s = 1.0 / (d_in ** 0.5)
        return {"w": u((d_out, d_in), s), "b": u((d_out,), s)}

    params = {
        "pos_lstm": lstm_params(input_dim, H),
        "pos_tagger": linear_params(2 * H, n_pos),
        # ac LSTM is built with input_dim; the module only works when input_dim == hidden_dim
        # (its input is the pos LSTM output of width 2H).
        "ac_lstm": lstm_params(input_dim, H),
        "ac_tagger": linear_params(2 * H, n_tag),
    }
    if subtask == "1":
        params["clf"] = linear_params(2 * n_tag, n_tag)
    return params


def _reorder_gates(w, h):
    """(4H, ...) PyTorch gate-row order (i,f,g,o) -> (i,f,o,g)."""
    w4 = w.reshape((4, h) + w.shape[1:])
    return jnp.concatenate([w4[0], w4[1], w4[3], w4[2]], axis=0)


def _prep_bilstm(p, h):
    def prep_dir(sfx):
        wih = _reorder_gates(p["w_ih_" + sfx], h).T                      # (D, 4H)
        whh = _reorder_gates(p["w_hh_" + sfx], h).T                      # (H, 4H)
        b = _reorder_gates(p["b_ih_" + sfx] + p["b_hh_" + sfx], h)       # (4H,)
        return wih, whh, b

    wih_f, whh_f, b_f = prep_dir("f")
    wih_b, whh_b, b_b = prep_dir("b")
    whh_bd = jnp.zeros((2 * h, 8 * h), jnp.float32)
    whh_bd = whh_bd.at[:h, :4 * h].set(whh_f).at[h:, 4 * h:].set(whh_b)  # block diagonal
    return {
        "wih": jnp.concatenate([wih_f, wih_b], axis=1).astype(_MM_DTYPE),   # (D, 8H) bf16
        "whh": whh_bd.astype(_MM_DTYPE),                                    # (2H, 8H) bf16
        "b": jnp.concatenate([b_f, b_b]).reshape(1, 8 * h),                 # (1, 8H) f32
    }


def _prep_linear(p):
    d_out, d_in = p["w"].shape
    d_pad = pl.cdiv(d_out, _LANE) * _LANE
    wt = jnp.zeros((d_in, d_pad), jnp.float32).at[:, :d_out].set(p["w"].T)
    b = jnp.zeros((1, d_pad), jnp.float32).at[:, :d_out].set(p["b"])
    return {"wt": wt.astype(_MM_DTYPE), "b": b}


def prepare_params(raw, hidden_dim, subtask):
    """One-time conversion to kernel-ready layout (transpose, gate reorder, bias fold, pad, bf16)."""
    h = hidden_dim // 2
    prepped = {
        "pos_lstm": _prep_bilstm(raw["pos_lstm"], h),
        "pos_tagger": _prep_linear(raw["pos_tagger"]),
        "ac_lstm": _prep_bilstm(raw["ac_lstm"], h),
        "ac_tagger": _prep_linear(raw["ac_tagger"]),
    }
    if subtask == "1":
        prepped["clf"] = _prep_linear(raw["clf"])
    return prepped


# ---------------------------------------------------------------------------
# Forward pass (mirrors SequenceTagger.forward, eval mode)
# ---------------------------------------------------------------------------

def sequence_tagger_forward(params, input_embedding, *, returning_layer, subtask,
                            n_pos, n_tag):
    T, B, D = input_embedding.shape
    H = params["pos_lstm"]["whh"].shape[0] // 2
    Bp = pl.cdiv(B, _SUBLANE) * _SUBLANE

    # Pad the batch to a sublane multiple once; work in flat (T*Bp, feat) layout throughout.
    x = input_embedding if Bp == B else jnp.pad(input_embedding, ((0, 0), (0, Bp - B), (0, 0)))
    x2d = x.reshape(T * Bp, D)

    if returning_layer == 0:
        _, pos_tag2d = lstm_tagger_flat(
            x2d, params["pos_lstm"], params["pos_tagger"], T, Bp, with_head=True)
        return pos_tag2d.reshape(T, Bp, -1)[:, :B, :n_pos]               # (T, B, n_pos)

    # returning_layer != 0: the POS tagger head is never used -> run the head-less variant.
    pos_states2d = lstm_tagger_flat(
        x2d, params["pos_lstm"], None, T, Bp, with_head=False)

    # hidden_states = dropout(pos output_states) -> identity in eval mode.
    assert D == 2 * H, "SequenceTagger requires input_dim == hidden_dim (ac LSTM input width)"
    _, ac_tag2d = lstm_tagger_flat(
        pos_states2d, params["ac_lstm"], params["ac_tagger"], T, Bp, with_head=True)
    predicted_tags = ac_tag2d.reshape(T, Bp, -1)[:, :, :n_tag]           # (T, Bp, n_tag)

    if subtask == "1":
        # Faithful to the PyTorch code: dim 1 is the *batch* axis; [:, -1] of the real
        # (unpadded) batch is index B-1.
        start_emb = predicted_tags[:, 0, :]
        end_emb = predicted_tags[:, B - 1, :]
        cat = jnp.concatenate([start_emb, end_emb], axis=1)              # (T, 2*n_tag)
        return linear_flat(cat, params["clf"])[:, :n_tag]                # (T, n_tag)
    return predicted_tags[:, :B, :]


# ---------------------------------------------------------------------------
# Pure-JAX reference of the PyTorch forward (for correctness checking)
# ---------------------------------------------------------------------------

def _ref_lstm_dir(x, w_ih, w_hh, b_ih, b_hh):
    _, B, _ = x.shape
    H = w_hh.shape[1]

    def step(carry, x_t):
        h, c = carry
        gates = x_t @ w_ih.T + h @ w_hh.T + b_ih + b_hh
        i = jax.nn.sigmoid(gates[:, :H])
        f = jax.nn.sigmoid(gates[:, H:2 * H])
        g = jnp.tanh(gates[:, 2 * H:3 * H])
        o = jax.nn.sigmoid(gates[:, 3 * H:])
        c = f * c + i * g
        h = o * jnp.tanh(c)
        return (h, c), h

    init = (jnp.zeros((B, H), jnp.float32), jnp.zeros((B, H), jnp.float32))
    _, hs = lax.scan(step, init, x)
    return hs


def _ref_bilstm(x, p):
    hf = _ref_lstm_dir(x, p["w_ih_f"], p["w_hh_f"], p["b_ih_f"], p["b_hh_f"])
    hb = _ref_lstm_dir(jnp.flip(x, 0), p["w_ih_b"], p["w_hh_b"], p["b_ih_b"], p["b_hh_b"])
    return jnp.concatenate([hf, jnp.flip(hb, 0)], axis=-1)


def _ref_linear(x, p, relu=False):
    if relu:
        x = jnp.maximum(x, 0.0)
    return x @ p["w"].T + p["b"]


def _ref_forward(raw, x, returning_layer, subtask):
    pos_states = _ref_bilstm(x, raw["pos_lstm"])
    if returning_layer == 0:
        return _ref_linear(pos_states, raw["pos_tagger"], relu=True)
    ac_states = _ref_bilstm(pos_states, raw["ac_lstm"])
    tags = _ref_linear(ac_states, raw["ac_tagger"], relu=True)
    if subtask == "1":
        cat = jnp.concatenate([tags[:, 0, :], tags[:, -1, :]], axis=1)
        return _ref_linear(cat, raw["clf"], relu=False)
    return tags


# ---------------------------------------------------------------------------
# Main
# ---------------------------------------------------------------------------

if __name__ == "__main__":
    # small shapes: seq=8, batch=2, input_dim == hidden_dim == 32 (required so the
    # ac LSTM input width matches), 5 POS tags, 7 AC tags, subtask '1'.
    T, B = 8, 2
    input_dim = 32
    hidden_dim = 32
    n_pos, n_tag = 5, 7
    subtask = "1"

    key = jax.random.PRNGKey(0)
    k_params, k_x = jax.random.split(key)
    raw = init_params(k_params, input_dim, hidden_dim, n_pos, n_tag, subtask)
    params = prepare_params(raw, hidden_dim, subtask)
    x = jax.random.normal(k_x, (T, B, input_dim), dtype=jnp.float32)

    fwd = jax.jit(sequence_tagger_forward,
                  static_argnames=("returning_layer", "subtask", "n_pos", "n_tag"))

    # returning_layer == 0 path (POS predictions)
    pos_out = jax.block_until_ready(
        fwd(params, x, returning_layer=0, subtask=subtask, n_pos=n_pos, n_tag=n_tag))
    assert pos_out.shape == (T, B, n_pos)

    # full path (subtask '1' classifier output)
    clf_out = jax.block_until_ready(
        fwd(params, x, returning_layer=1, subtask=subtask, n_pos=n_pos, n_tag=n_tag))
    assert clf_out.shape == (T, n_tag)

    # Validate against a pure-JAX f32 reference of the PyTorch forward.
    # Tolerance is loosened vs. the f32 kernel: MXU operands are bf16 (f32 accumulate), and
    # the rounding compounds across T recurrent steps and two stacked layers.
    ref_pos = _ref_forward(raw, x, 0, subtask)
    ref_clf = _ref_forward(raw, x, 1, subtask)
    assert jnp.allclose(pos_out, ref_pos, rtol=5e-2, atol=5e-2), "POS output mismatch vs reference"
    assert jnp.allclose(clf_out, ref_clf, rtol=5e-2, atol=5e-2), "CLF output mismatch vs reference"

    print("KERNEL_OK")
</pallas_src>

<mosaic_0001>
module attributes {stable_mosaic.version = 11 : i64} {
  func.func @_bilstm_tagger_kernel(%arg0: memref<64x32xf32, #tpu.memory_space<vmem>>, %arg1: memref<32x128xbf16, #tpu.memory_space<vmem>>, %arg2: memref<32x128xbf16, #tpu.memory_space<vmem>>, %arg3: memref<1x128xf32, #tpu.memory_space<vmem>>, %arg4: memref<32x128xbf16, #tpu.memory_space<vmem>>, %arg5: memref<1x128xf32, #tpu.memory_space<vmem>>, %arg6: memref<64x32xf32, #tpu.memory_space<vmem>>, %arg7: memref<64x128xf32, #tpu.memory_space<vmem>>, %arg8: memref<64x128xf32, #tpu.memory_space<vmem>>) attributes {dimension_semantics = [], scalar_prefetch = 0 : i64, scratch_operands = 1 : i64, tpu.core_type = #tpu.core_type<tc>} {
    %c0 = arith.constant 0 : index
    %c0_0 = arith.constant 0 : index
    %0 = vector.load %arg0[%c0, %c0_0] : memref<64x32xf32, #tpu.memory_space<vmem>>, vector<64x32xf32>
    %1 = arith.truncf %0 : vector<64x32xf32> to vector<64x32xbf16>
    %c0_1 = arith.constant 0 : index
    %c0_2 = arith.constant 0 : index
    %2 = vector.load %arg1[%c0_1, %c0_2] : memref<32x128xbf16, #tpu.memory_space<vmem>>, vector<32x128xbf16>
    %cst = arith.constant dense<0.000000e+00> : vector<64x128xf32>
    %3 = tpu.matmul %1, %2, %cst {dimension_numbers = #tpu.dot_dimension_numbers<[1], [0], [0], [1], [0, 0, 1, 1], [], []>} : vector<64x32xbf16>, vector<32x128xbf16>, vector<64x128xf32> -> vector<64x128xf32>
    %c0_3 = arith.constant 0 : index
    %c0_4 = arith.constant 0 : index
    %4 = vector.load %arg3[%c0_3, %c0_4] : memref<1x128xf32, #tpu.memory_space<vmem>>, vector<1x128xf32>
    %5 = vector.broadcast %4 : vector<1x128xf32> to vector<64x128xf32>
    %6 = arith.addf %3, %5 : vector<64x128xf32>
    %c0_5 = arith.constant 0 : index
    %c0_6 = arith.constant 0 : index
    %7 = vector.load %arg8[%c0_5, %c0_6] : memref<64x128xf32, #tpu.memory_space<vmem>>, vector<64x128xf32>
    tpu.vector_store %arg8[%c0_5, %c0_6], %6 {strides = array<i32>} : memref<64x128xf32, #tpu.memory_space<vmem>>, vector<64x128xf32>,
    %c0_7 = arith.constant 0 : index
    %c0_8 = arith.constant 0 : index
    %8 = vector.load %arg2[%c0_7, %c0_8] : memref<32x128xbf16, #tpu.memory_space<vmem>>, vector<32x128xbf16>
    %cst_9 = arith.constant 0.000000e+00 : f32
    %9 = vector.broadcast %cst_9 : f32 to vector<8x32xf32>
    %cst_10 = arith.constant 0.000000e+00 : f32
    %10 = vector.broadcast %cst_10 : f32 to vector<8x32xf32>
    %c0_i32 = arith.constant 0 : i32
    %c8_i32 = arith.constant 8 : i32
    %11 = arith.muli %c0_i32, %c8_i32 : i32
    %12 = tpu.assume_multiple %11, 8 : i32
    %c7_i32 = arith.constant 7 : i32
    %13 = arith.subi %c7_i32, %c0_i32 : i32
    %c8_i32_11 = arith.constant 8 : i32
    %14 = arith.muli %13, %c8_i32_11 : i32
    %15 = tpu.assume_multiple %14, 8 : i32
    %16 = arith.index_cast %12 : i32 to index
    %c0_12 = arith.constant 0 : index
    %17 = vector.load %arg8[%16, %c0_12] : memref<64x128xf32, #tpu.memory_space<vmem>>, vector<8x64xf32>
    %18 = arith.index_cast %15 : i32 to index
    %c64 = arith.constant 64 : index
    %19 = vector.load %arg8[%18, %c64] : memref<64x128xf32, #tpu.memory_space<vmem>>, vector<8x64xf32>
    %20 = arith.truncf %9 : vector<8x32xf32> to vector<8x32xbf16>
    %cst_13 = arith.constant dense<0.000000e+00> : vector<8x128xf32>
    %21 = tpu.matmul %20, %8, %cst_13 {dimension_numbers = #tpu.dot_dimension_numbers<[1], [0], [0], [1], [0, 0, 1, 1], [], []>} : vector<8x32xbf16>, vector<32x128xbf16>, vector<8x128xf32> -> vector<8x128xf32>
    %22 = vector.extract_strided_slice %21 {offsets = [0, 0], sizes = [8, 64], strides = [1, 1]} : vector<8x128xf32> to vector<8x64xf32>
    %23 = arith.addf %17, %22 : vector<8x64xf32>
    %24 = vector.extract_strided_slice %21 {offsets = [0, 64], sizes = [8, 64], strides = [1, 1]} : vector<8x128xf32> to vector<8x64xf32>
    %25 = arith.addf %19, %24 : vector<8x64xf32>
    %26 = vector.extract_strided_slice %23 {offsets = [0, 0], sizes = [8, 48], strides = [1, 1]} : vector<8x64xf32> to vector<8x48xf32>
    %27 = arith.negf %26 : vector<8x48xf32>
    %28 = math.exp %27 : vector<8x48xf32>
    %cst_14 = arith.constant 1.000000e+00 : f32
    %29 = vector.broadcast %cst_14 : f32 to vector<8x48xf32>
    %30 = arith.addf %29, %28 : vector<8x48xf32>
    %31 = arith.divf %29, %30 : vector<8x48xf32>
    %32 = vector.extract_strided_slice %25 {offsets = [0, 0], sizes = [8, 48], strides = [1, 1]} : vector<8x64xf32> to vector<8x48xf32>
    %33 = arith.negf %32 : vector<8x48xf32>
    %34 = math.exp %33 : vector<8x48xf32>
    %cst_15 = arith.constant 1.000000e+00 : f32
    %35 = vector.broadcast %cst_15 : f32 to vector<8x48xf32>
    %36 = arith.addf %35, %34 : vector<8x48xf32>
    %37 = arith.divf %35, %36 : vector<8x48xf32>
    %38 = vector.extract_strided_slice %23 {offsets = [0, 48], sizes = [8, 16], strides = [1, 1]} : vector<8x64xf32> to vector<8x16xf32>
    %39 = math.tanh %38 : vector<8x16xf32>
    %40 = vector.extract_strided_slice %25 {offsets = [0, 48], sizes = [8, 16], strides = [1, 1]} : vector<8x64xf32> to vector<8x16xf32>
    %41 = math.tanh %40 : vector<8x16xf32>
    %42 = vector.extract_strided_slice %31 {offsets = [0, 16], sizes = [8, 16], strides = [1, 1]} : vector<8x48xf32> to vector<8x16xf32>
    %43 = vector.extract_strided_slice %10 {offsets = [0, 0], sizes = [8, 16], strides = [1, 1]} : vector<8x32xf32> to vector<8x16xf32>
    %44 = arith.mulf %42, %43 : vector<8x16xf32>
    %45 = vector.extract_strided_slice %31 {offsets = [0, 0], sizes = [8, 16], strides = [1, 1]} : vector<8x48xf32> to vector<8x16xf32>
    %46 = arith.mulf %45, %39 : vector<8x16xf32>
    %47 = arith.addf %44, %46 : vector<8x16xf32>
    %48 = vector.extract_strided_slice %37 {offsets = [0, 16], sizes = [8, 16], strides = [1, 1]} : vector<8x48xf32> to vector<8x16xf32>
    %49 = vector.extract_strided_slice %10 {offsets = [0, 16], sizes = [8, 16], strides = [1, 1]} : vector<8x32xf32> to vector<8x16xf32>
    %50 = arith.mulf %48, %49 : vector<8x16xf32>
    %51 = vector.extract_strided_slice %37 {offsets = [0, 0], sizes = [8, 16], strides = [1, 1]} : vector<8x48xf32> to vector<8x16xf32>
    %52 = arith.mulf %51, %41 : vector<8x16xf32>
    %53 = arith.addf %50, %52 : vector<8x16xf32>
    %54 = tpu.concatenate %47, %53 in 1 : vector<8x16xf32>, vector<8x16xf32> -> vector<8x32xf32>
    %55 = math.tanh %54 : vector<8x32xf32>
    %56 = vector.extract_strided_slice %31 {offsets = [0, 32], sizes = [8, 16], strides = [1, 1]} : vector<8x48xf32> to vector<8x16xf32>
    %57 = vector.extract_strided_slice %55 {offsets = [0, 0], sizes = [8, 16], strides = [1, 1]} : vector<8x32xf32> to vector<8x16xf32>
    %58 = arith.mulf %56, %57 : vector<8x16xf32>
    %59 = vector.extract_strided_slice %37 {offsets = [0, 32], sizes = [8, 16], strides = [1, 1]} : vector<8x48xf32> to vector<8x16xf32>
    %60 = vector.extract_strided_slice %55 {offsets = [0, 16], sizes = [8, 16], strides = [1, 1]} : vector<8x32xf32> to vector<8x16xf32>
    %61 = arith.mulf %59, %60 : vector<8x16xf32>
    %62 = arith.index_cast %12 : i32 to index
    %c0_16 = arith.constant 0 : index
    %63 = vector.load %arg6[%62, %c0_16] : memref<64x32xf32, #tpu.memory_space<vmem>>, vector<8x16xf32>
    tpu.vector_store %arg6[%62, %c0_16], %58 {strides = array<i32>} : memref<64x32xf32, #tpu.memory_space<vmem>>, vector<8x16xf32>,
    %64 = arith.index_cast %15 : i32 to index
    %c16 = arith.constant 16 : index
    %65 = vector.load %arg6[%64, %c16] : memref<64x32xf32, #tpu.memory_space<vmem>>, vector<8x16xf32>
    tpu.vector_store %arg6[%64, %c16], %61 {strides = array<i32>} : memref<64x32xf32, #tpu.memory_space<vmem>>, vector<8x16xf32>,
    %66 = tpu.concatenate %58, %61 in 1 : vector<8x16xf32>, vector<8x16xf32> -> vector<8x32xf32>
    %c1_i32 = arith.constant 1 : i32
    %c8_i32_17 = arith.constant 8 : i32
    %67 = arith.muli %c1_i32, %c8_i32_17 : i32
    %68 = tpu.assume_multiple %67, 8 : i32
    %c7_i32_18 = arith.constant 7 : i32
    %69 = arith.subi %c7_i32_18, %c1_i32 : i32
    %c8_i32_19 = arith.constant 8 : i32
    %70 = arith.muli %69, %c8_i32_19 : i32
    %71 = tpu.assume_multiple %70, 8 : i32
    %72 = arith.index_cast %68 : i32 to index
    %c0_20 = arith.constant 0 : index
    %73 = vector.load %arg8[%72, %c0_20] : memref<64x128xf32, #tpu.memory_space<vmem>>, vector<8x64xf32>
    %74 = arith.index_cast %71 : i32 to index
    %c64_21 = arith.constant 64 : index
    %75 = vector.load %arg8[%74, %c64_21] : memref<64x128xf32, #tpu.memory_space<vmem>>, vector<8x64xf32>
    %76 = arith.truncf %66 : vector<8x32xf32> to vector<8x32xbf16>
    %cst_22 = arith.constant dense<0.000000e+00> : vector<8x128xf32>
    %77 = tpu.matmul %76, %8, %cst_22 {dimension_numbers = #tpu.dot_dimension_numbers<[1], [0], [0], [1], [0, 0, 1, 1], [], []>} : vector<8x32xbf16>, vector<32x128xbf16>, vector<8x128xf32> -> vector<8x128xf32>
    %78 = vector.extract_strided_slice %77 {offsets = [0, 0], sizes = [8, 64], strides = [1, 1]} : vector<8x128xf32> to vector<8x64xf32>
    %79 = arith.addf %73, %78 : vector<8x64xf32>
    %80 = vector.extract_strided_slice %77 {offsets = [0, 64], sizes = [8, 64], strides = [1, 1]} : vector<8x128xf32> to vector<8x64xf32>
    %81 = arith.addf %75, %80 : vector<8x64xf32>
    %82 = vector.extract_strided_slice %79 {offsets = [0, 0], sizes = [8, 48], strides = [1, 1]} : vector<8x64xf32> to vector<8x48xf32>
    %83 = arith.negf %82 : vector<8x48xf32>
    %84 = math.exp %83 : vector<8x48xf32>
    %cst_23 = arith.constant 1.000000e+00 : f32
    %85 = vector.broadcast %cst_23 : f32 to vector<8x48xf32>
    %86 = arith.addf %85, %84 : vector<8x48xf32>
    %87 = arith.divf %85, %86 : vector<8x48xf32>
    %88 = vector.extract_strided_slice %81 {offsets = [0, 0], sizes = [8, 48], strides = [1, 1]} : vector<8x64xf32> to vector<8x48xf32>
    %89 = arith.negf %88 : vector<8x48xf32>
    %90 = math.exp %89 : vector<8x48xf32>
    %cst_24 = arith.constant 1.000000e+00 : f32
    %91 = vector.broadcast %cst_24 : f32 to vector<8x48xf32>
    %92 = arith.addf %91, %90 : vector<8x48xf32>
    %93 = arith.divf %91, %92 : vector<8x48xf32>
    %94 = vector.extract_strided_slice %79 {offsets = [0, 48], sizes = [8, 16], strides = [1, 1]} : vector<8x64xf32> to vector<8x16xf32>
    %95 = math.tanh %94 : vector<8x16xf32>
    %96 = vector.extract_strided_slice %81 {offsets = [0, 48], sizes = [8, 16], strides = [1, 1]} : vector<8x64xf32> to vector<8x16xf32>
    %97 = math.tanh %96 : vector<8x16xf32>
    %98 = vector.extract_strided_slice %87 {offsets = [0, 16], sizes = [8, 16], strides = [1, 1]} : vector<8x48xf32> to vector<8x16xf32>
    %99 = vector.extract_strided_slice %54 {offsets = [0, 0], sizes = [8, 16], strides = [1, 1]} : vector<8x32xf32> to vector<8x16xf32>
    %100 = arith.mulf %98, %99 : vector<8x16xf32>
    %101 = vector.extract_strided_slice %87 {offsets = [0, 0], sizes = [8, 16], strides = [1, 1]} : vector<8x48xf32> to vector<8x16xf32>
    %102 = arith.mulf %101, %95 : vector<8x16xf32>
    %103 = arith.addf %100, %102 : vector<8x16xf32>
    %104 = vector.extract_strided_slice %93 {offsets = [0, 16], sizes = [8, 16], strides = [1, 1]} : vector<8x48xf32> to vector<8x16xf32>
    %105 = vector.extract_strided_slice %54 {offsets = [0, 16], sizes = [8, 16], strides = [1, 1]} : vector<8x32xf32> to vector<8x16xf32>
    %106 = arith.mulf %104, %105 : vector<8x16xf32>
    %107 = vector.extract_strided_slice %93 {offsets = [0, 0], sizes = [8, 16], strides = [1, 1]} : vector<8x48xf32> to vector<8x16xf32>
    %108 = arith.mulf %107, %97 : vector<8x16xf32>
    %109 = arith.addf %106, %108 : vector<8x16xf32>
    %110 = tpu.concatenate %103, %109 in 1 : vector<8x16xf32>, vector<8x16xf32> -> vector<8x32xf32>
    %111 = math.tanh %110 : vector<8x32xf32>
    %112 = vector.extract_strided_slice %87 {offsets = [0, 32], sizes = [8, 16], strides = [1, 1]} : vector<8x48xf32> to vector<8x16xf32>
    %113 = vector.extract_strided_slice %111 {offsets = [0, 0], sizes = [8, 16], strides = [1, 1]} : vector<8x32xf32> to vector<8x16xf32>
    %114 = arith.mulf %112, %113 : vector<8x16xf32>
    %115 = vector.extract_strided_slice %93 {offsets = [0, 32], sizes = [8, 16], strides = [1, 1]} : vector<8x48xf32> to vector<8x16xf32>
    %116 = vector.extract_strided_slice %111 {offsets = [0, 16], sizes = [8, 16], strides = [1, 1]} : vector<8x32xf32> to vector<8x16xf32>
    %117 = arith.mulf %115, %116 : vector<8x16xf32>
    %118 = arith.index_cast %68 : i32 to index
    %c0_25 = arith.constant 0 : index
    %119 = vector.load %arg6[%118, %c0_25] : memref<64x32xf32, #tpu.memory_space<vmem>>, vector<8x16xf32>
    tpu.vector_store %arg6[%118, %c0_25], %114 {strides = array<i32>} : memref<64x32xf32, #tpu.memory_space<vmem>>, vector<8x16xf32>,
    %120 = arith.index_cast %71 : i32 to index
    %c16_26 = arith.constant 16 : index
    %121 = vector.load %arg6[%120, %c16_26] : memref<64x32xf32, #tpu.memory_space<vmem>>, vector<8x16xf32>
    tpu.vector_store %arg6[%120, %c16_26], %117 {strides = array<i32>} : memref<64x32xf32, #tpu.memory_space<vmem>>, vector<8x16xf32>,
    %122 = tpu.concatenate %114, %117 in 1 : vector<8x16xf32>, vector<8x16xf32> -> vector<8x32xf32>
    %c2_i32 = arith.constant 2 : i32
    %c8_i32_27 = arith.constant 8 : i32
    %123 = arith.muli %c2_i32, %c8_i32_27 : i32
    %124 = tpu.assume_multiple %123, 8 : i32
    %c7_i32_28 = arith.constant 7 : i32
    %125 = arith.subi %c7_i32_28, %c2_i32 : i32
    %c8_i32_29 = arith.constant 8 : i32
    %126 = arith.muli %125, %c8_i32_29 : i32
    %127 = tpu.assume_multiple %126, 8 : i32
    %128 = arith.index_cast %124 : i32 to index
    %c0_30 = arith.constant 0 : index
    %129 = vector.load %arg8[%128, %c0_30] : memref<64x128xf32, #tpu.memory_space<vmem>>, vector<8x64xf32>
    %130 = arith.index_cast %127 : i32 to index
    %c64_31 = arith.constant 64 : index
    %131 = vector.load %arg8[%130, %c64_31] : memref<64x128xf32, #tpu.memory_space<vmem>>, vector<8x64xf32>
    %132 = arith.truncf %122 : vector<8x32xf32> to vector<8x32xbf16>
    %cst_32 = arith.constant dense<0.000000e+00> : vector<8x128xf32>
    %133 = tpu.matmul %132, %8, %cst_32 {dimension_numbers = #tpu.dot_dimension_numbers<[1], [0], [0], [1], [0, 0, 1, 1], [], []>} : vector<8x32xbf16>, vector<32x128xbf16>, vector<8x128xf32> -> vector<8x128xf32>
    %134 = vector.extract_strided_slice %133 {offsets = [0, 0], sizes = [8, 64], strides = [1, 1]} : vector<8x128xf32> to vector<8x64xf32>
    %135 = arith.addf %129, %134 : vector<8x64xf32>
    %136 = vector.extract_strided_slice %133 {offsets = [0, 64], sizes = [8, 64], strides = [1, 1]} : vector<8x128xf32> to vector<8x64xf32>
    %137 = arith.addf %131, %136 : vector<8x64xf32>
    %138 = vector.extract_strided_slice %135 {offsets = [0, 0], sizes = [8, 48], strides = [1, 1]} : vector<8x64xf32> to vector<8x48xf32>
    %139 = arith.negf %138 : vector<8x48xf32>
    %140 = math.exp %139 : vector<8x48xf32>
    %cst_33 = arith.constant 1.000000e+00 : f32
    %141 = vector.broadcast %cst_33 : f32 to vector<8x48xf32>
    %142 = arith.addf %141, %140 : vector<8x48xf32>
    %143 = arith.divf %141, %142 : vector<8x48xf32>
    %144 = vector.extract_strided_slice %137 {offsets = [0, 0], sizes = [8, 48], strides = [1, 1]} : vector<8x64xf32> to vector<8x48xf32>
    %145 = arith.negf %144 : vector<8x48xf32>
    %146 = math.exp %145 : vector<8x48xf32>
    %cst_34 = arith.constant 1.000000e+00 : f32
    %147 = vector.broadcast %cst_34 : f32 to vector<8x48xf32>
    %148 = arith.addf %147, %146 : vector<8x48xf32>
    %149 = arith.divf %147, %148 : vector<8x48xf32>
    %150 = vector.extract_strided_slice %135 {offsets = [0, 48], sizes = [8, 16], strides = [1, 1]} : vector<8x64xf32> to vector<8x16xf32>
    %151 = math.tanh %150 : vector<8x16xf32>
    %152 = vector.extract_strided_slice %137 {offsets = [0, 48], sizes = [8, 16], strides = [1, 1]} : vector<8x64xf32> to vector<8x16xf32>
    %153 = math.tanh %152 : vector<8x16xf32>
    %154 = vector.extract_strided_slice %143 {offsets = [0, 16], sizes = [8, 16], strides = [1, 1]} : vector<8x48xf32> to vector<8x16xf32>
    %155 = vector.extract_strided_slice %110 {offsets = [0, 0], sizes = [8, 16], strides = [1, 1]} : vector<8x32xf32> to vector<8x16xf32>
    %156 = arith.mulf %154, %155 : vector<8x16xf32>
    %157 = vector.extract_strided_slice %143 {offsets = [0, 0], sizes = [8, 16], strides = [1, 1]} : vector<8x48xf32> to vector<8x16xf32>
    %158 = arith.mulf %157, %151 : vector<8x16xf32>
    %159 = arith.addf %156, %158 : vector<8x16xf32>
    %160 = vector.extract_strided_slice %149 {offsets = [0, 16], sizes = [8, 16], strides = [1, 1]} : vector<8x48xf32> to vector<8x16xf32>
    %161 = vector.extract_strided_slice %110 {offsets = [0, 16], sizes = [8, 16], strides = [1, 1]} : vector<8x32xf32> to vector<8x16xf32>
    %162 = arith.mulf %160, %161 : vector<8x16xf32>
    %163 = vector.extract_strided_slice %149 {offsets = [0, 0], sizes = [8, 16], strides = [1, 1]} : vector<8x48xf32> to vector<8x16xf32>
    %164 = arith.mulf %163, %153 : vector<8x16xf32>
    %165 = arith.addf %162, %164 : vector<8x16xf32>
    %166 = tpu.concatenate %159, %165 in 1 : vector<8x16xf32>, vector<8x16xf32> -> vector<8x32xf32>
    %167 = math.tanh %166 : vector<8x32xf32>
    %168 = vector.extract_strided_slice %143 {offsets = [0, 32], sizes = [8, 16], strides = [1, 1]} : vector<8x48xf32> to vector<8x16xf32>
    %169 = vector.extract_strided_slice %167 {offsets = [0, 0], sizes = [8, 16], strides = [1, 1]} : vector<8x32xf32> to vector<8x16xf32>
    %170 = arith.mulf %168, %169 : vector<8x16xf32>
    %171 = vector.extract_strided_slice %149 {offsets = [0, 32], sizes = [8, 16], strides = [1, 1]} : vector<8x48xf32> to vector<8x16xf32>
    %172 = vector.extract_strided_slice %167 {offsets = [0, 16], sizes = [8, 16], strides = [1, 1]} : vector<8x32xf32> to vector<8x16xf32>
    %173 = arith.mulf %171, %172 : vector<8x16xf32>
    %174 = arith.index_cast %124 : i32 to index
    %c0_35 = arith.constant 0 : index
    %175 = vector.load %arg6[%174, %c0_35] : memref<64x32xf32, #tpu.memory_space<vmem>>, vector<8x16xf32>
    tpu.vector_store %arg6[%174, %c0_35], %170 {strides = array<i32>} : memref<64x32xf32, #tpu.memory_space<vmem>>, vector<8x16xf32>,
    %176 = arith.index_cast %127 : i32 to index
    %c16_36 = arith.constant 16 : index
    %177 = vector.load %arg6[%176, %c16_36] : memref<64x32xf32, #tpu.memory_space<vmem>>, vector<8x16xf32>
    tpu.vector_store %arg6[%176, %c16_36], %173 {strides = array<i32>} : memref<64x32xf32, #tpu.memory_space<vmem>>, vector<8x16xf32>,
    %178 = tpu.concatenate %170, %173 in 1 : vector<8x16xf32>, vector<8x16xf32> -> vector<8x32xf32>
    %c3_i32 = arith.constant 3 : i32
    %c8_i32_37 = arith.constant 8 : i32
    %179 = arith.muli %c3_i32, %c8_i32_37 : i32
    %180 = tpu.assume_multiple %179, 8 : i32
    %c7_i32_38 = arith.constant 7 : i32
    %181 = arith.subi %c7_i32_38, %c3_i32 : i32
    %c8_i32_39 = arith.constant 8 : i32
    %182 = arith.muli %181, %c8_i32_39 : i32
    %183 = tpu.assume_multiple %182, 8 : i32
    %184 = arith.index_cast %180 : i32 to index
    %c0_40 = arith.constant 0 : index
    %185 = vector.load %arg8[%184, %c0_40] : memref<64x128xf32, #tpu.memory_space<vmem>>, vector<8x64xf32>
    %186 = arith.index_cast %183 : i32 to index
    %c64_41 = arith.constant 64 : index
    %187 = vector.load %arg8[%186, %c64_41] : memref<64x128xf32, #tpu.memory_space<vmem>>, vector<8x64xf32>
    %188 = arith.truncf %178 : vector<8x32xf32> to vector<8x32xbf16>
    %cst_42 = arith.constant dense<0.000000e+00> : vector<8x128xf32>
    %189 = tpu.matmul %188, %8, %cst_42 {dimension_numbers = #tpu.dot_dimension_numbers<[1], [0], [0], [1], [0, 0, 1, 1], [], []>} : vector<8x32xbf16>, vector<32x128xbf16>, vector<8x128xf32> -> vector<8x128xf32>
    %190 = vector.extract_strided_slice %189 {offsets = [0, 0], sizes = [8, 64], strides = [1, 1]} : vector<8x128xf32> to vector<8x64xf32>
    %191 = arith.addf %185, %190 : vector<8x64xf32>
    %192 = vector.extract_strided_slice %189 {offsets = [0, 64], sizes = [8, 64], strides = [1, 1]} : vector<8x128xf32> to vector<8x64xf32>
    %193 = arith.addf %187, %192 : vector<8x64xf32>
    %194 = vector.extract_strided_slice %191 {offsets = [0, 0], sizes = [8, 48], strides = [1, 1]} : vector<8x64xf32> to vector<8x48xf32>
    %195 = arith.negf %194 : vector<8x48xf32>
    %196 = math.exp %195 : vector<8x48xf32>
    %cst_43 = arith.constant 1.000000e+00 : f32
    %197 = vector.broadcast %cst_43 : f32 to vector<8x48xf32>
    %198 = arith.addf %197, %196 : vector<8x48xf32>
    %199 = arith.divf %197, %198 : vector<8x48xf32>
    %200 = vector.extract_strided_slice %193 {offsets = [0, 0], sizes = [8, 48], strides = [1, 1]} : vector<8x64xf32> to vector<8x48xf32>
    %201 = arith.negf %200 : vector<8x48xf32>
    %202 = math.exp %201 : vector<8x48xf32>
    %cst_44 = arith.constant 1.000000e+00 : f32
    %203 = vector.broadcast %cst_44 : f32 to vector<8x48xf32>
    %204 = arith.addf %203, %202 : vector<8x48xf32>
    %205 = arith.divf %203, %204 : vector<8x48xf32>
    %206 = vector.extract_strided_slice %191 {offsets = [0, 48], sizes = [8, 16], strides = [1, 1]} : vector<8x64xf32> to vector<8x16xf32>
    %207 = math.tanh %206 : vector<8x16xf32>
    %208 = vector.extract_strided_slice %193 {offsets = [0, 48], sizes = [8, 16], strides = [1, 1]} : vector<8x64xf32> to vector<8x16xf32>
    %209 = math.tanh %208 : vector<8x16xf32>
    %210 = vector.extract_strided_slice %199 {offsets = [0, 16], sizes = [8, 16], strides = [1, 1]} : vector<8x48xf32> to vector<8x16xf32>
    %211 = vector.extract_strided_slice %166 {offsets = [0, 0], sizes = [8, 16], strides = [1, 1]} : vector<8x32xf32> to vector<8x16xf32>
    %212 = arith.mulf %210, %211 : vector<8x16xf32>
    %213 = vector.extract_strided_slice %199 {offsets = [0, 0], sizes = [8, 16], strides = [1, 1]} : vector<8x48xf32> to vector<8x16xf32>
    %214 = arith.mulf %213, %207 : vector<8x16xf32>
    %215 = arith.addf %212, %214 : vector<8x16xf32>
    %216 = vector.extract_strided_slice %205 {offsets = [0, 16], sizes = [8, 16], strides = [1, 1]} : vector<8x48xf32> to vector<8x16xf32>
    %217 = vector.extract_strided_slice %166 {offsets = [0, 16], sizes = [8, 16], strides = [1, 1]} : vector<8x32xf32> to vector<8x16xf32>
    %218 = arith.mulf %216, %217 : vector<8x16xf32>
    %219 = vector.extract_strided_slice %205 {offsets = [0, 0], sizes = [8, 16], strides = [1, 1]} : vector<8x48xf32> to vector<8x16xf32>
    %220 = arith.mulf %219, %209 : vector<8x16xf32>
    %221 = arith.addf %218, %220 : vector<8x16xf32>
    %222 = tpu.concatenate %215, %221 in 1 : vector<8x16xf32>, vector<8x16xf32> -> vector<8x32xf32>
    %223 = math.tanh %222 : vector<8x32xf32>
    %224 = vector.extract_strided_slice %199 {offsets = [0, 32], sizes = [8, 16], strides = [1, 1]} : vector<8x48xf32> to vector<8x16xf32>
    %225 = vector.extract_strided_slice %223 {offsets = [0, 0], sizes = [8, 16], strides = [1, 1]} : vector<8x32xf32> to vector<8x16xf32>
    %226 = arith.mulf %224, %225 : vector<8x16xf32>
    %227 = vector.extract_strided_slice %205 {offsets = [0, 32], sizes = [8, 16], strides = [1, 1]} : vector<8x48xf32> to vector<8x16xf32>
    %228 = vector.extract_strided_slice %223 {offsets = [0, 16], sizes = [8, 16], strides = [1, 1]} : vector<8x32xf32> to vector<8x16xf32>
    %229 = arith.mulf %227, %228 : vector<8x16xf32>
    %230 = arith.index_cast %180 : i32 to index
    %c0_45 = arith.constant 0 : index
    %231 = vector.load %arg6[%230, %c0_45] : memref<64x32xf32, #tpu.memory_space<vmem>>, vector<8x16xf32>
    tpu.vector_store %arg6[%230, %c0_45], %226 {strides = array<i32>} : memref<64x32xf32, #tpu.memory_space<vmem>>, vector<8x16xf32>,
    %232 = arith.index_cast %183 : i32 to index
    %c16_46 = arith.constant 16 : index
    %233 = vector.load %arg6[%232, %c16_46] : memref<64x32xf32, #tpu.memory_space<vmem>>, vector<8x16xf32>
    tpu.vector_store %arg6[%232, %c16_46], %229 {strides = array<i32>} : memref<64x32xf32, #tpu.memory_space<vmem>>, vector<8x16xf32>,
    %234 = tpu.concatenate %226, %229 in 1 : vector<8x16xf32>, vector<8x16xf32> -> vector<8x32xf32>
    %c4_i32 = arith.constant 4 : i32
    %c8_i32_47 = arith.constant 8 : i32
    %235 = arith.muli %c4_i32, %c8_i32_47 : i32
    %236 = tpu.assume_multiple %235, 8 : i32
    %c7_i32_48 = arith.constant 7 : i32
    %237 = arith.subi %c7_i32_48, %c4_i32 : i32
    %c8_i32_49 = arith.constant 8 : i32
    %238 = arith.muli %237, %c8_i32_49 : i32
    %239 = tpu.assume_multiple %238, 8 : i32
    %240 = arith.index_cast %236 : i32 to index
    %c0_50 = arith.constant 0 : index
    %241 = vector.load %arg8[%240, %c0_50] : memref<64x128xf32, #tpu.memory_space<vmem>>, vector<8x64xf32>
    %242 = arith.index_cast %239 : i32 to index
    %c64_51 = arith.constant 64 : index
    %243 = vector.load %arg8[%242, %c64_51] : memref<64x128xf32, #tpu.memory_space<vmem>>, vector<8x64xf32>
    %244 = arith.truncf %234 : vector<8x32xf32> to vector<8x32xbf16>
    %cst_52 = arith.constant dense<0.000000e+00> : vector<8x128xf32>
    %245 = tpu.matmul %244, %8, %cst_52 {dimension_numbers = #tpu.dot_dimension_numbers<[1], [0], [0], [1], [0, 0, 1, 1], [], []>} : vector<8x32xbf16>, vector<32x128xbf16>, vector<8x128xf32> -> vector<8x128xf32>
    %246 = vector.extract_strided_slice %245 {offsets = [0, 0], sizes = [8, 64], strides = [1, 1]} : vector<8x128xf32> to vector<8x64xf32>
    %247 = arith.addf %241, %246 : vector<8x64xf32>
    %248 = vector.extract_strided_slice %245 {offsets = [0, 64], sizes = [8, 64], strides = [1, 1]} : vector<8x128xf32> to vector<8x64xf32>
    %249 = arith.addf %243, %248 : vector<8x64xf32>
    %250 = vector.extract_strided_slice %247 {offsets = [0, 0], sizes = [8, 48], strides = [1, 1]} : vector<8x64xf32> to vector<8x48xf32>
    %251 = arith.negf %250 : vector<8x48xf32>
    %252 = math.exp %251 : vector<8x48xf32>
    %cst_53 = arith.constant 1.000000e+00 : f32
    %253 = vector.broadcast %cst_53 : f32 to vector<8x48xf32>
    %254 = arith.addf %253, %252 : vector<8x48xf32>
    %255 = arith.divf %253, %254 : vector<8x48xf32>
    %256 = vector.extract_strided_slice %249 {offsets = [0, 0], sizes = [8, 48], strides = [1, 1]} : vector<8x64xf32> to vector<8x48xf32>
    %257 = arith.negf %256 : vector<8x48xf32>
    %258 = math.exp %257 : vector<8x48xf32>
    %cst_54 = arith.constant 1.000000e+00 : f32
    %259 = vector.broadcast %cst_54 : f32 to vector<8x48xf32>
    %260 = arith.addf %259, %258 : vector<8x48xf32>
    %261 = arith.divf %259, %260 : vector<8x48xf32>
    %262 = vector.extract_strided_slice %247 {offsets = [0, 48], sizes = [8, 16], strides = [1, 1]} : vector<8x64xf32> to vector<8x16xf32>
    %263 = math.tanh %262 : vector<8x16xf32>
    %264 = vector.extract_strided_slice %249 {offsets = [0, 48], sizes = [8, 16], strides = [1, 1]} : vector<8x64xf32> to vector<8x16xf32>
    %265 = math.tanh %264 : vector<8x16xf32>
    %266 = vector.extract_strided_slice %255 {offsets = [0, 16], sizes = [8, 16], strides = [1, 1]} : vector<8x48xf32> to vector<8x16xf32>
    %267 = vector.extract_strided_slice %222 {offsets = [0, 0], sizes = [8, 16], strides = [1, 1]} : vector<8x32xf32> to vector<8x16xf32>
    %268 = arith.mulf %266, %267 : vector<8x16xf32>
    %269 = vector.extract_strided_slice %255 {offsets = [0, 0], sizes = [8, 16], strides = [1, 1]} : vector<8x48xf32> to vector<8x16xf32>
    %270 = arith.mulf %269, %263 : vector<8x16xf32>
    %271 = arith.addf %268, %270 : vector<8x16xf32>
    %272 = vector.extract_strided_slice %261 {offsets = [0, 16], sizes = [8, 16], strides = [1, 1]} : vector<8x48xf32> to vector<8x16xf32>
    %273 = vector.extract_strided_slice %222 {offsets = [0, 16], sizes = [8, 16], strides = [1, 1]} : vector<8x32xf32> to vector<8x16xf32>
    %274 = arith.mulf %272, %273 : vector<8x16xf32>
    %275 = vector.extract_strided_slice %261 {offsets = [0, 0], sizes = [8, 16], strides = [1, 1]} : vector<8x48xf32> to vector<8x16xf32>
    %276 = arith.mulf %275, %265 : vector<8x16xf32>
    %277 = arith.addf %274, %276 : vector<8x16xf32>
    %278 = tpu.concatenate %271, %277 in 1 : vector<8x16xf32>, vector<8x16xf32> -> vector<8x32xf32>
    %279 = math.tanh %278 : vector<8x32xf32>
    %280 = vector.extract_strided_slice %255 {offsets = [0, 32], sizes = [8, 16], strides = [1, 1]} : vector<8x48xf32> to vector<8x16xf32>
    %281 = vector.extract_strided_slice %279 {offsets = [0, 0], sizes = [8, 16], strides = [1, 1]} : vector<8x32xf32> to vector<8x16xf32>
    %282 = arith.mulf %280, %281 : vector<8x16xf32>
    %283 = vector.extract_strided_slice %261 {offsets = [0, 32], sizes = [8, 16], strides = [1, 1]} : vector<8x48xf32> to vector<8x16xf32>
    %284 = vector.extract_strided_slice %279 {offsets = [0, 16], sizes = [8, 16], strides = [1, 1]} : vector<8x32xf32> to vector<8x16xf32>
    %285 = arith.mulf %283, %284 : vector<8x16xf32>
    %286 = arith.index_cast %236 : i32 to index
    %c0_55 = arith.constant 0 : index
    %287 = vector.load %arg6[%286, %c0_55] : memref<64x32xf32, #tpu.memory_space<vmem>>, vector<8x16xf32>
    tpu.vector_store %arg6[%286, %c0_55], %282 {strides = array<i32>} : memref<64x32xf32, #tpu.memory_space<vmem>>, vector<8x16xf32>,
    %288 = arith.index_cast %239 : i32 to index
    %c16_56 = arith.constant 16 : index
    %289 = vector.load %arg6[%288, %c16_56] : memref<64x32xf32, #tpu.memory_space<vmem>>, vector<8x16xf32>
    tpu.vector_store %arg6[%288, %c16_56], %285 {strides = array<i32>} : memref<64x32xf32, #tpu.memory_space<vmem>>, vector<8x16xf32>,
    %290 = tpu.concatenate %282, %285 in 1 : vector<8x16xf32>, vector<8x16xf32> -> vector<8x32xf32>
    %c5_i32 = arith.constant 5 : i32
    %c8_i32_57 = arith.constant 8 : i32
    %291 = arith.muli %c5_i32, %c8_i32_57 : i32
    %292 = tpu.assume_multiple %291, 8 : i32
    %c7_i32_58 = arith.constant 7 : i32
    %293 = arith.subi %c7_i32_58, %c5_i32 : i32
    %c8_i32_59 = arith.constant 8 : i32
    %294 = arith.muli %293, %c8_i32_59 : i32
    %295 = tpu.assume_multiple %294, 8 : i32
    %296 = arith.index_cast %292 : i32 to index
    %c0_60 = arith.constant 0 : index
    %297 = vector.load %arg8[%296, %c0_60] : memref<64x128xf32, #tpu.memory_space<vmem>>, vector<8x64xf32>
    %298 = arith.index_cast %295 : i32 to index
    %c64_61 = arith.constant 64 : index
    %299 = vector.load %arg8[%298, %c64_61] : memref<64x128xf32, #tpu.memory_space<vmem>>, vector<8x64xf32>
    %300 = arith.truncf %290 : vector<8x32xf32> to vector<8x32xbf16>
    %cst_62 = arith.constant dense<0.000000e+00> : vector<8x128xf32>
    %301 = tpu.matmul %300, %8, %cst_62 {dimension_numbers = #tpu.dot_dimension_numbers<[1], [0], [0], [1], [0, 0, 1, 1], [], []>} : vector<8x32xbf16>, vector<32x128xbf16>, vector<8x128xf32> -> vector<8x128xf32>
    %302 = vector.extract_strided_slice %301 {offsets = [0, 0], sizes = [8, 64], strides = [1, 1]} : vector<8x128xf32> to vector<8x64xf32>
    %303 = arith.addf %297, %302 : vector<8x64xf32>
    %304 = vector.extract_strided_slice %301 {offsets = [0, 64], sizes = [8, 64], strides = [1, 1]} : vector<8x128xf32> to vector<8x64xf32>
    %305 = arith.addf %299, %304 : vector<8x64xf32>
    %306 = vector.extract_strided_slice %303 {offsets = [0, 0], sizes = [8, 48], strides = [1, 1]} : vector<8x64xf32> to vector<8x48xf32>
    %307 = arith.negf %306 : vector<8x48xf32>
    %308 = math.exp %307 : vector<8x48xf32>
    %cst_63 = arith.constant 1.000000e+00 : f32
    %309 = vector.broadcast %cst_63 : f32 to vector<8x48xf32>
    %310 = arith.addf %309, %308 : vector<8x48xf32>
    %311 = arith.divf %309, %310 : vector<8x48xf32>
    %312 = vector.extract_strided_slice %305 {offsets = [0, 0], sizes = [8, 48], strides = [1, 1]} : vector<8x64xf32> to vector<8x48xf32>
    %313 = arith.negf %312 : vector<8x48xf32>
    %314 = math.exp %313 : vector<8x48xf32>
    %cst_64 = arith.constant 1.000000e+00 : f32
    %315 = vector.broadcast %cst_64 : f32 to vector<8x48xf32>
    %316 = arith.addf %315, %314 : vector<8x48xf32>
    %317 = arith.divf %315, %316 : vector<8x48xf32>
    %318 = vector.extract_strided_slice %303 {offsets = [0, 48], sizes = [8, 16], strides = [1, 1]} : vector<8x64xf32> to vector<8x16xf32>
    %319 = math.tanh %318 : vector<8x16xf32>
    %320 = vector.extract_strided_slice %305 {offsets = [0, 48], sizes = [8, 16], strides = [1, 1]} : vector<8x64xf32> to vector<8x16xf32>
    %321 = math.tanh %320 : vector<8x16xf32>
    %322 = vector.extract_strided_slice %311 {offsets = [0, 16], sizes = [8, 16], strides = [1, 1]} : vector<8x48xf32> to vector<8x16xf32>
    %323 = vector.extract_strided_slice %278 {offsets = [0, 0], sizes = [8, 16], strides = [1, 1]} : vector<8x32xf32> to vector<8x16xf32>
    %324 = arith.mulf %322, %323 : vector<8x16xf32>
    %325 = vector.extract_strided_slice %311 {offsets = [0, 0], sizes = [8, 16], strides = [1, 1]} : vector<8x48xf32> to vector<8x16xf32>
    %326 = arith.mulf %325, %319 : vector<8x16xf32>
    %327 = arith.addf %324, %326 : vector<8x16xf32>
    %328 = vector.extract_strided_slice %317 {offsets = [0, 16], sizes = [8, 16], strides = [1, 1]} : vector<8x48xf32> to vector<8x16xf32>
    %329 = vector.extract_strided_slice %278 {offsets = [0, 16], sizes = [8, 16], strides = [1, 1]} : vector<8x32xf32> to vector<8x16xf32>
    %330 = arith.mulf %328, %329 : vector<8x16xf32>
    %331 = vector.extract_strided_slice %317 {offsets = [0, 0], sizes = [8, 16], strides = [1, 1]} : vector<8x48xf32> to vector<8x16xf32>
    %332 = arith.mulf %331, %321 : vector<8x16xf32>
    %333 = arith.addf %330, %332 : vector<8x16xf32>
    %334 = tpu.concatenate %327, %333 in 1 : vector<8x16xf32>, vector<8x16xf32> -> vector<8x32xf32>
    %335 = math.tanh %334 : vector<8x32xf32>
    %336 = vector.extract_strided_slice %311 {offsets = [0, 32], sizes = [8, 16], strides = [1, 1]} : vector<8x48xf32> to vector<8x16xf32>
    %337 = vector.extract_strided_slice %335 {offsets = [0, 0], sizes = [8, 16], strides = [1, 1]} : vector<8x32xf32> to vector<8x16xf32>
    %338 = arith.mulf %336, %337 : vector<8x16xf32>
    %339 = vector.extract_strided_slice %317 {offsets = [0, 32], sizes = [8, 16], strides = [1, 1]} : vector<8x48xf32> to vector<8x16xf32>
    %340 = vector.extract_strided_slice %335 {offsets = [0, 16], sizes = [8, 16], strides = [1, 1]} : vector<8x32xf32> to vector<8x16xf32>
    %341 = arith.mulf %339, %340 : vector<8x16xf32>
    %342 = arith.index_cast %292 : i32 to index
    %c0_65 = arith.constant 0 : index
    %343 = vector.load %arg6[%342, %c0_65] : memref<64x32xf32, #tpu.memory_space<vmem>>, vector<8x16xf32>
    tpu.vector_store %arg6[%342, %c0_65], %338 {strides = array<i32>} : memref<64x32xf32, #tpu.memory_space<vmem>>, vector<8x16xf32>,
    %344 = arith.index_cast %295 : i32 to index
    %c16_66 = arith.constant 16 : index
    %345 = vector.load %arg6[%344, %c16_66] : memref<64x32xf32, #tpu.memory_space<vmem>>, vector<8x16xf32>
    tpu.vector_store %arg6[%344, %c16_66], %341 {strides = array<i32>} : memref<64x32xf32, #tpu.memory_space<vmem>>, vector<8x16xf32>,
    %346 = tpu.concatenate %338, %341 in 1 : vector<8x16xf32>, vector<8x16xf32> -> vector<8x32xf32>
    %c6_i32 = arith.constant 6 : i32
    %c8_i32_67 = arith.constant 8 : i32
    %347 = arith.muli %c6_i32, %c8_i32_67 : i32
    %348 = tpu.assume_multiple %347, 8 : i32
    %c7_i32_68 = arith.constant 7 : i32
    %349 = arith.subi %c7_i32_68, %c6_i32 : i32
    %c8_i32_69 = arith.constant 8 : i32
    %350 = arith.muli %349, %c8_i32_69 : i32
    %351 = tpu.assume_multiple %350, 8 : i32
    %352 = arith.index_cast %348 : i32 to index
    %c0_70 = arith.constant 0 : index
    %353 = vector.load %arg8[%352, %c0_70] : memref<64x128xf32, #tpu.memory_space<vmem>>, vector<8x64xf32>
    %354 = arith.index_cast %351 : i32 to index
    %c64_71 = arith.constant 64 : index
    %355 = vector.load %arg8[%354, %c64_71] : memref<64x128xf32, #tpu.memory_space<vmem>>, vector<8x64xf32>
    %356 = arith.truncf %346 : vector<8x32xf32> to vector<8x32xbf16>
    %cst_72 = arith.constant dense<0.000000e+00> : vector<8x128xf32>
    %357 = tpu.matmul %356, %8, %cst_72 {dimension_numbers = #tpu.dot_dimension_numbers<[1], [0], [0], [1], [0, 0, 1, 1], [], []>} : vector<8x32xbf16>, vector<32x128xbf16>, vector<8x128xf32> -> vector<8x128xf32>
    %358 = vector.extract_strided_slice %357 {offsets = [0, 0], sizes = [8, 64], strides = [1, 1]} : vector<8x128xf32> to vector<8x64xf32>
    %359 = arith.addf %353, %358 : vector<8x64xf32>
    %360 = vector.extract_strided_slice %357 {offsets = [0, 64], sizes = [8, 64], strides = [1, 1]} : vector<8x128xf32> to vector<8x64xf32>
    %361 = arith.addf %355, %360 : vector<8x64xf32>
    %362 = vector.extract_strided_slice %359 {offsets = [0, 0], sizes = [8, 48], strides = [1, 1]} : vector<8x64xf32> to vector<8x48xf32>
    %363 = arith.negf %362 : vector<8x48xf32>
    %364 = math.exp %363 : vector<8x48xf32>
    %cst_73 = arith.constant 1.000000e+00 : f32
    %365 = vector.broadcast %cst_73 : f32 to vector<8x48xf32>
    %366 = arith.addf %365, %364 : vector<8x48xf32>
    %367 = arith.divf %365, %366 : vector<8x48xf32>
    %368 = vector.extract_strided_slice %361 {offsets = [0, 0], sizes = [8, 48], strides = [1, 1]} : vector<8x64xf32> to vector<8x48xf32>
    %369 = arith.negf %368 : vector<8x48xf32>
    %370 = math.exp %369 : vector<8x48xf32>
    %cst_74 = arith.constant 1.000000e+00 : f32
    %371 = vector.broadcast %cst_74 : f32 to vector<8x48xf32>
    %372 = arith.addf %371, %370 : vector<8x48xf32>
    %373 = arith.divf %371, %372 : vector<8x48xf32>
    %374 = vector.extract_strided_slice %359 {offsets = [0, 48], sizes = [8, 16], strides = [1, 1]} : vector<8x64xf32> to vector<8x16xf32>
    %375 = math.tanh %374 : vector<8x16xf32>
    %376 = vector.extract_strided_slice %361 {offsets = [0, 48], sizes = [8, 16], strides = [1, 1]} : vector<8x64xf32> to vector<8x16xf32>
    %377 = math.tanh %376 : vector<8x16xf32>
    %378 = vector.extract_strided_slice %367 {offsets = [0, 16], sizes = [8, 16], strides = [1, 1]} : vector<8x48xf32> to vector<8x16xf32>
    %379 = vector.extract_strided_slice %334 {offsets = [0, 0], sizes = [8, 16], strides = [1, 1]} : vector<8x32xf32> to vector<8x16xf32>
    %380 = arith.mulf %378, %379 : vector<8x16xf32>
    %381 = vector.extract_strided_slice %367 {offsets = [0, 0], sizes = [8, 16], strides = [1, 1]} : vector<8x48xf32> to vector<8x16xf32>
    %382 = arith.mulf %381, %375 : vector<8x16xf32>
    %383 = arith.addf %380, %382 : vector<8x16xf32>
    %384 = vector.extract_strided_slice %373 {offsets = [0, 16], sizes = [8, 16], strides = [1, 1]} : vector<8x48xf32> to vector<8x16xf32>
    %385 = vector.extract_strided_slice %334 {offsets = [0, 16], sizes = [8, 16], strides = [1, 1]} : vector<8x32xf32> to vector<8x16xf32>
    %386 = arith.mulf %384, %385 : vector<8x16xf32>
    %387 = vector.extract_strided_slice %373 {offsets = [0, 0], sizes = [8, 16], strides = [1, 1]} : vector<8x48xf32> to vector<8x16xf32>
    %388 = arith.mulf %387, %377 : vector<8x16xf32>
    %389 = arith.addf %386, %388 : vector<8x16xf32>
    %390 = tpu.concatenate %383, %389 in 1 : vector<8x16xf32>, vector<8x16xf32> -> vector<8x32xf32>
    %391 = math.tanh %390 : vector<8x32xf32>
    %392 = vector.extract_strided_slice %367 {offsets = [0, 32], sizes = [8, 16], strides = [1, 1]} : vector<8x48xf32> to vector<8x16xf32>
    %393 = vector.extract_strided_slice %391 {offsets = [0, 0], sizes = [8, 16], strides = [1, 1]} : vector<8x32xf32> to vector<8x16xf32>
    %394 = arith.mulf %392, %393 : vector<8x16xf32>
    %395 = vector.extract_strided_slice %373 {offsets = [0, 32], sizes = [8, 16], strides = [1, 1]} : vector<8x48xf32> to vector<8x16xf32>
    %396 = vector.extract_strided_slice %391 {offsets = [0, 16], sizes = [8, 16], strides = [1, 1]} : vector<8x32xf32> to vector<8x16xf32>
    %397 = arith.mulf %395, %396 : vector<8x16xf32>
    %398 = arith.index_cast %348 : i32 to index
    %c0_75 = arith.constant 0 : index
    %399 = vector.load %arg6[%398, %c0_75] : memref<64x32xf32, #tpu.memory_space<vmem>>, vector<8x16xf32>
    tpu.vector_store %arg6[%398, %c0_75], %394 {strides = array<i32>} : memref<64x32xf32, #tpu.memory_space<vmem>>, vector<8x16xf32>,
    %400 = arith.index_cast %351 : i32 to index
    %c16_76 = arith.constant 16 : index
    %401 = vector.load %arg6[%400, %c16_76] : memref<64x32xf32, #tpu.memory_space<vmem>>, vector<8x16xf32>
    tpu.vector_store %arg6[%400, %c16_76], %397 {strides = array<i32>} : memref<64x32xf32, #tpu.memory_space<vmem>>, vector<8x16xf32>,
    %402 = tpu.concatenate %394, %397 in 1 : vector<8x16xf32>, vector<8x16xf32> -> vector<8x32xf32>
    %c7_i32_77 = arith.constant 7 : i32
    %c8_i32_78 = arith.constant 8 : i32
    %403 = arith.muli %c7_i32_77, %c8_i32_78 : i32
    %404 = tpu.assume_multiple %403, 8 : i32
    %c7_i32_79 = arith.constant 7 : i32
    %405 = arith.subi %c7_i32_79, %c7_i32_77 : i32
    %c8_i32_80 = arith.constant 8 : i32
    %406 = arith.muli %405, %c8_i32_80 : i32
    %407 = tpu.assume_multiple %406, 8 : i32
    %408 = arith.index_cast %404 : i32 to index
    %c0_81 = arith.constant 0 : index
    %409 = vector.load %arg8[%408, %c0_81] : memref<64x128xf32, #tpu.memory_space<vmem>>, vector<8x64xf32>
    %410 = arith.index_cast %407 : i32 to index
    %c64_82 = arith.constant 64 : index
    %411 = vector.load %arg8[%410, %c64_82] : memref<64x128xf32, #tpu.memory_space<vmem>>, vector<8x64xf32>
    %412 = arith.truncf %402 : vector<8x32xf32> to vector<8x32xbf16>
    %cst_83 = arith.constant dense<0.000000e+00> : vector<8x128xf32>
    %413 = tpu.matmul %412, %8, %cst_83 {dimension_numbers = #tpu.dot_dimension_numbers<[1], [0], [0], [1], [0, 0, 1, 1], [], []>} : vector<8x32xbf16>, vector<32x128xbf16>, vector<8x128xf32> -> vector<8x128xf32>
    %414 = vector.extract_strided_slice %413 {offsets = [0, 0], sizes = [8, 64], strides = [1, 1]} : vector<8x128xf32> to vector<8x64xf32>
    %415 = arith.addf %409, %414 : vector<8x64xf32>
    %416 = vector.extract_strided_slice %413 {offsets = [0, 64], sizes = [8, 64], strides = [1, 1]} : vector<8x128xf32> to vector<8x64xf32>
    %417 = arith.addf %411, %416 : vector<8x64xf32>
    %418 = vector.extract_strided_slice %415 {offsets = [0, 0], sizes = [8, 48], strides = [1, 1]} : vector<8x64xf32> to vector<8x48xf32>
    %419 = arith.negf %418 : vector<8x48xf32>
    %420 = math.exp %419 : vector<8x48xf32>
    %cst_84 = arith.constant 1.000000e+00 : f32
    %421 = vector.broadcast %cst_84 : f32 to vector<8x48xf32>
    %422 = arith.addf %421, %420 : vector<8x48xf32>
    %423 = arith.divf %421, %422 : vector<8x48xf32>
    %424 = vector.extract_strided_slice %417 {offsets = [0, 0], sizes = [8, 48], strides = [1, 1]} : vector<8x64xf32> to vector<8x48xf32>
    %425 = arith.negf %424 : vector<8x48xf32>
    %426 = math.exp %425 : vector<8x48xf32>
    %cst_85 = arith.constant 1.000000e+00 : f32
    %427 = vector.broadcast %cst_85 : f32 to vector<8x48xf32>
    %428 = arith.addf %427, %426 : vector<8x48xf32>
    %429 = arith.divf %427, %428 : vector<8x48xf32>
    %430 = vector.extract_strided_slice %415 {offsets = [0, 48], sizes = [8, 16], strides = [1, 1]} : vector<8x64xf32> to vector<8x16xf32>
    %431 = math.tanh %430 : vector<8x16xf32>
    %432 = vector.extract_strided_slice %417 {offsets = [0, 48], sizes = [8, 16], strides = [1, 1]} : vector<8x64xf32> to vector<8x16xf32>
    %433 = math.tanh %432 : vector<8x16xf32>
    %434 = vector.extract_strided_slice %423 {offsets = [0, 16], sizes = [8, 16], strides = [1, 1]} : vector<8x48xf32> to vector<8x16xf32>
    %435 = vector.extract_strided_slice %390 {offsets = [0, 0], sizes = [8, 16], strides = [1, 1]} : vector<8x32xf32> to vector<8x16xf32>
    %436 = arith.mulf %434, %435 : vector<8x16xf32>
    %437 = vector.extract_strided_slice %423 {offsets = [0, 0], sizes = [8, 16], strides = [1, 1]} : vector<8x48xf32> to vector<8x16xf32>
    %438 = arith.mulf %437, %431 : vector<8x16xf32>
    %439 = arith.addf %436, %438 : vector<8x16xf32>
    %440 = vector.extract_strided_slice %429 {offsets = [0, 16], sizes = [8, 16], strides = [1, 1]} : vector<8x48xf32> to vector<8x16xf32>
    %441 = vector.extract_strided_slice %390 {offsets = [0, 16], sizes = [8, 16], strides = [1, 1]} : vector<8x32xf32> to vector<8x16xf32>
    %442 = arith.mulf %440, %441 : vector<8x16xf32>
    %443 = vector.extract_strided_slice %429 {offsets = [0, 0], sizes = [8, 16], strides = [1, 1]} : vector<8x48xf32> to vector<8x16xf32>
    %444 = arith.mulf %443, %433 : vector<8x16xf32>
    %445 = arith.addf %442, %444 : vector<8x16xf32>
    %446 = tpu.concatenate %439, %445 in 1 : vector<8x16xf32>, vector<8x16xf32> -> vector<8x32xf32>
    %447 = math.tanh %446 : vector<8x32xf32>
    %448 = vector.extract_strided_slice %423 {offsets = [0, 32], sizes = [8, 16], strides = [1, 1]} : vector<8x48xf32> to vector<8x16xf32>
    %449 = vector.extract_strided_slice %447 {offsets = [0, 0], sizes = [8, 16], strides = [1, 1]} : vector<8x32xf32> to vector<8x16xf32>
    %450 = arith.mulf %448, %449 : vector<8x16xf32>
    %451 = vector.extract_strided_slice %429 {offsets = [0, 32], sizes = [8, 16], strides = [1, 1]} : vector<8x48xf32> to vector<8x16xf32>
    %452 = vector.extract_strided_slice %447 {offsets = [0, 16], sizes = [8, 16], strides = [1, 1]} : vector<8x32xf32> to vector<8x16xf32>
    %453 = arith.mulf %451, %452 : vector<8x16xf32>
    %454 = arith.index_cast %404 : i32 to index
    %c0_86 = arith.constant 0 : index
    %455 = vector.load %arg6[%454, %c0_86] : memref<64x32xf32, #tpu.memory_space<vmem>>, vector<8x16xf32>
    tpu.vector_store %arg6[%454, %c0_86], %450 {strides = array<i32>} : memref<64x32xf32, #tpu.memory_space<vmem>>, vector<8x16xf32>,
    %456 = arith.index_cast %407 : i32 to index
    %c16_87 = arith.constant 16 : index
    %457 = vector.load %arg6[%456, %c16_87] : memref<64x32xf32, #tpu.memory_space<vmem>>, vector<8x16xf32>
    tpu.vector_store %arg6[%456, %c16_87], %453 {strides = array<i32>} : memref<64x32xf32, #tpu.memory_space<vmem>>, vector<8x16xf32>,
    %458 = tpu.concatenate %450, %453 in 1 : vector<8x16xf32>, vector<8x16xf32> -> vector<8x32xf32>
    %c8_i32_88 = arith.constant 8 : i32
    %c0_89 = arith.constant 0 : index
    %c0_90 = arith.constant 0 : index
    %459 = vector.load %arg6[%c0_89, %c0_90] : memref<64x32xf32, #tpu.memory_space<vmem>>, vector<64x32xf32>
    %cst_91 = arith.constant 0.000000e+00 : f32
    %460 = vector.broadcast %cst_91 : f32 to vector<64x32xf32>
    %461 = arith.maximumf %459, %460 : vector<64x32xf32>
    %462 = arith.truncf %461 : vector<64x32xf32> to vector<64x32xbf16>
    %c0_92 = arith.constant 0 : index
    %c0_93 = arith.constant 0 : index
    %463 = vector.load %arg4[%c0_92, %c0_93] : memref<32x128xbf16, #tpu.memory_space<vmem>>, vector<32x128xbf16>
    %cst_94 = arith.constant dense<0.000000e+00> : vector<64x128xf32>
    %464 = tpu.matmul %462, %463, %cst_94 {dimension_numbers = #tpu.dot_dimension_numbers<[1], [0], [0], [1], [0, 0, 1, 1], [], []>} : vector<64x32xbf16>, vector<32x128xbf16>, vector<64x128xf32> -> vector<64x128xf32>
    %c0_95 = arith.constant 0 : index
    %c0_96 = arith.constant 0 : index
    %465 = vector.load %arg5[%c0_95, %c0_96] : memref<1x128xf32, #tpu.memory_space<vmem>>, vector<1x128xf32>
    %466 = vector.broadcast %465 : vector<1x128xf32> to vector<64x128xf32>
    %467 = arith.addf %464, %466 : vector<64x128xf32>
    %c0_97 = arith.constant 0 : index
    %c0_98 = arith.constant 0 : index
    %468 = vector.load %arg7[%c0_97, %c0_98] : memref<64x128xf32, #tpu.memory_space<vmem>>, vector<64x128xf32>
    tpu.vector_store %arg7[%c0_97, %c0_98], %467 {strides = array<i32>} : memref<64x128xf32, #tpu.memory_space<vmem>>, vector<64x128xf32>,
    return
  }
}

</mosaic_0001>

<bundles_post_ra>
// kernel: sequence_tagger_forward.1
= control target key start
LH: loop header
LB: loop body
LE: loop exit
PB: predicated region body
PF: predicated region fallthrough
CT: control target
= control target key end

     0   :  { %vm62_vm0 = vcmask 261120   ;;  %v1609_v15 = vmov 0.0   ;;  %s1970_s0 = inlined_call_operand.vmem [shape: f32[64,32], index: 0, kind: input, shape index: {}]   ;;  %s1971_s1 = inlined_call_operand.vmem [shape: bf16[32,128], index: 1, kind: input, shape index: {}]   ;;  %s1972_s2 = inlined_call_operand.vmem [shape: bf16[32,128], index: 2, kind: input, shape index: {}]   ;;  %s1973_s3 = inlined_call_operand.vmem [shape: f32[1,128], index: 3, kind: input, shape index: {}]   ;;  %s1974_s4 = inlined_call_operand.vmem [shape: bf16[32,128], index: 4, kind: input, shape index: {}]   ;;  %s1975_s5 = inlined_call_operand.vmem [shape: f32[1,128], index: 5, kind: input, shape index: {}]   ;;  %s1976_s6 = inlined_call_operand.hbm [shape: f32[64,32], index: 6, kind: output, shape index: {0}]   ;;  %s1977_s7 = inlined_call_operand.vmem [shape: f32[64,128], index: 7, kind: output, shape index: {1}]  }
   0x1   :  { %v1467_v0 = vld [vmem:[%s1971_s1] sm:$0xff]   ;;  %v1468_v1 = vld [vmem:[%s1971_s1 + $0x8] sm:$0xff]   ;;  %v33_v4 = vld [vmem:[%s1970_s0 + $0x30] sm:$0xff] }
   0x2   :  { %1450 = vmatprep.subr.bf16.mxu1 %v1467_v0  ;;  %1362 = vmatprep.subr.bf16.mxu0 %v1467_v0  ;;  %v31_v2 = vld [vmem:[%s1970_s0 + $0x20] sm:$0xff]  ;;  %v32_v3 = vld [vmem:[%s1970_s0 + $0x28] sm:$0xff]  ;;  %v34_v6 = vld [vmem:[%s1970_s0 + $0x38] sm:$0xff] }
   0x3   :  { %1452 = vmatpush3.bf16.msra.mxu1 %v1467_v0  ;;  %1363 = vmatpush3.bf16.msra.mxu0 %v1467_v0  ;;  %v37_v5 = vpack.c.bf16 %v32_v3, %v31_v2  ;;  %v27_v7 = vld [vmem:[%s1970_s0] sm:$0xff]  ;;  %v28_v8 = vld [vmem:[%s1970_s0 + $0x8] sm:$0xff]  ;;  %v29_v10 = vld [vmem:[%s1970_s0 + $0x10] sm:$0xff]  ;;  %v38_v12 = vpack.c.bf16 %v34_v6, %v33_v4 }
   0x4   :  { %1451 = vmatprep.subr.bf16.mxu1 %v1468_v1  ;;  %1364 = vmatprep.subr.bf16.mxu0 %v1468_v1  ;;  %v35_v9 = vpack.c.bf16 %v28_v8, %v27_v7  ;;  %v30_v11 = vld [vmem:[%s1970_s0 + $0x18] sm:$0xff]  ;;  %v1696_v13 = vld [vmem:[%s1972_s2] sm:$0xff]  }
   0x5   :  { %1370 = vmatprep.mubr.msk.bf16.mxu1 %vm62_vm0, %v37_v5  ;;  %v36_v14 = vpack.c.bf16 %v30_v11, %v29_v10 }
   0x6   :  { %1366 = vmatprep.mubr.msk.bf16.mxu0 %vm62_vm0, %v35_v9 }
   0x7   :  { %1453 = vmatpush3.bf16.msra.mxu1 %v1468_v1  ;;  %1365 = vmatpush3.bf16.msra.mxu0 %v1468_v1 }
   0x8   :  { %1374 = vmatprep.subr.bf16.mxu1 %v1609_v15 }
   0x9   :  { %13 = vsyncpa [#allocation4], 0  ;;  %1390 = vmatprep.subr.bf16.mxu0 %v1609_v15  ;;  %v1707_v16 = vld [vmem:[%s1972_s2 + $0x8] sm:$0xff]   ;;  %vm1610_vm1 = vmmov 0   ;;  %v1611_v17 = vmov 0   ;;  %s1613_s24 = smov 16  }
   0xa   :  { %1371 = vmatmul.mubr.msk.bf16.vlgmr.msra.gmra.mrb[0].mxu1 %vm62_vm0, %v38_v12  ;;  %1367 = vmatmul.mubr.msk.bf16.vlgmr.msra.gmra.mrb[0].mxu0 %vm62_vm0, %v36_v14  ;;  %v1287_v18 = vld [vmem:[%s1973_s3] ss:$0 sm:$0xff]  ;;  %s1612_s3 = smov 80   ;;  %s1614_s25 = smov 112   ;;  %vm256_vm2 = vcmask 130048   ;;  %vm278_vm3 = vcmask 261248  }
   0xb   :  { %1375 = vmatpush3.bf16.msra.mxu1 %v1696_v13  ;;  %1378 = vmatprep.mubr.msk.bf16.mxu1 %vm1610_vm1, %v1609_v15  ;;  %s1615_s26 = smov 64   ;;  %s1616_s27 = smov 32  }
   0xc   :  { %1376 = vmatprep.subr.bf16.mxu1 %v1609_v15  ;;  %1391 = vmatpush3.bf16.msra.mxu0 %v1696_v13  ;;  %s1617_s28 = smov 48   ;;  %s1618_s29 = smov 96  }
   0xd   :  { %1392 = vmatprep.subr.bf16.mxu0 %v1609_v15  ;;  %1394 = vmatprep.mubr.msk.bf16.mxu0 %vm1610_vm1, %v1609_v15 }
   0xf   :  { %1377 = vmatpush3.bf16.msra.mxu1 %v1707_v16 }
  0x10   :  { %1382 = vmatprep.subr.bf16.mxu1 %v1609_v15  ;;  %1393 = vmatpush3.bf16.msra.mxu0 %v1707_v16 }
  0x11   :  { %1406 = vmatprep.subr.bf16.mxu0 %v1609_v15 }
  0x12   :  { %1379 = vmatmul.mubr.bf16.vlgmr.msra.gmra.mrb[4].mxu1 %v1611_v17 }
  0x13   :  { %1383 = vmatpush3.bf16.msra.mxu1 %v1696_v13  ;;  %1386 = vmatprep.mubr.msk.bf16.mxu1 %vm1610_vm1, %v1609_v15 }
  0x14   :  { %1384 = vmatprep.subr.bf16.mxu1 %v1609_v15 }
  0x17   :  { %1385 = vmatpush3.bf16.msra.mxu1 %v1707_v16 }
  0x18   :  { %1398 = vmatprep.subr.bf16.mxu1 %v1609_v15 }
  0xdd   :  { %v1372_v19 = vpop.f32.mrb[0].mxu1  ;;  %v1368_v20 = vpop.f32.mrb[0].mxu0 }
  0xde   :  { %v1729_v21 = vadd.f32 %v1372_v19, %v1287_v18  ;;  %v125_v22 = vpop.f32.mrb[1].mxu1  ;;  %v1731_v23 = vadd.f32 %v1368_v20, %v1287_v18  ;;  %v109_v24 = vpop.f32.mrb[1].mxu0 }
  0xdf   :  { %v1733_v25 = vadd.f32 %v1287_v18, %v125_v22  ;;  %v1373_v26 = vpop.f32.mrb[2].mxu1  ;;  %v1369_v27 = vpop.f32.mrb[2].mxu0  ;;  %v1741_v33 = vadd.f32 %v1287_v18, %v109_v24 }
  0xe0   :  { %v128_v28 = vpop.f32.mrb[3].mxu1  ;;  %v1735_v29 = vadd.f32 %v1369_v27, %v1287_v18  ;;  %v112_v30 = vpop.f32.mrb[3].mxu0  ;;  %v1743_v35 = vadd.f32 %v1373_v26, %v1287_v18 }
  0xe1   :  { %v1737_v31 = vadd.f32 %v1287_v18, %v128_v28  ;;  %v1739_v32 = vadd.f32 %v1287_v18, %v112_v30 }
  0xe5   :  { %v204_v34 = vpop.f32.mrb[4].mxu1 }
  0xe6   :  { %v210_v36 = vadd.f32 %v204_v34, %v1741_v33  ;;  %v1380_v37 = vpop.f32.mrb[5].mxu1  ;;  %v211_v39 = vadd.f32 %v204_v34, %v1743_v35 }
  0xe7   :  { %v207_v38 = vpop.f32.mrb[6].mxu1 }
  0xe8   :  { %1473 = vtanh.f32 %v210_v36  ;;  %v1381_v40 = vpop.f32.mrb[7].mxu1  ;;  %v1296_v43 = vmul.f32 -1.442695, %v210_v36  ;;  %v1297_v44 = vmul.f32 -1.442695, %v211_v39 }
  0xe9   :  { %1475 = vtanh.f32 %v211_v39 }
  0xea   :  { %1477 = vpow2.f32 %v1296_v43 }
  0xeb   :  { %1479 = vpow2.f32 %v1297_v44 }
  0xf2   :  { %v1474_v41 = vpop.eup %1473 }
  0xf3   :  { %228 = vrot.lane.b32.xlu0 %v1474_v41, %s1612_s3  ;;  %v1476_v42 = vpop.eup %1475 }
  0xf4   :  { %v1478_v45 = vpop.eup %1477 }
  0xf5   :  { %v215_v46 = vadd.f32 1.0, %v1478_v45  ;;  %v1480_v47 = vpop.eup %1479 }
  0xf6   :  { %v221_v48 = vadd.f32 1.0, %v1480_v47 }
  0xf7   :  { %239 = vrot.lane.b32.xlu0 %v1476_v42, %s1612_s3  ;;  %1481 = vrcp.f32 %v215_v46 }
  0xf8   :  { %1483 = vrcp.f32 %v221_v48 }
 0x101   :  { %v1482_v49 = vpop.eup %1481 }
 0x102   :  { %v1484_v52 = vpop.eup %1483  ;;  %v226_v55 = vmul.f32 0.0, %v1482_v49 }
 0x103   :  { %v237_v58 = vmul.f32 0.0, %v1484_v52 }
 0x165   :  { %v229_v50 = vpop.permute.xlu0 %228 }
 0x166   :  { %v231_v51 = vmul.f32 %v1482_v49, %v229_v50 }
 0x168   :  { %233 = vrot.lane.b32.xlu1 %v231_v51, %s1613_s24 }
 0x169   :  { %v240_v53 = vpop.permute.xlu0 %239 }
 0x16a   :  { %v242_v54 = vmul.f32 %v1484_v52, %v240_v53 }
 0x16c   :  { %244 = vrot.lane.b32.xlu1 %v242_v54, %s1613_s24 }
 0x1da   :  { %v234_v56 = vpop.permute.xlu1 %233 }
 0x1db   :  { %v236_v57 = vadd.f32 %v234_v56, %v226_v55 }
 0x1dd   :  { %249 = vrot.lane.b32.xlu0 %v236_v57, %s1614_s25 }
 0x1de   :  { %v245_v59 = vpop.permute.xlu1 %244 }
 0x1df   :  { %v247_v60 = vadd.f32 %v245_v59, %v237_v58 }
 0x1e1   :  { %253 = vrot.lane.b32.xlu1 %v247_v60, %s1615_s26 }
 0x24f   :  { %v250_v61 = vpop.permute.xlu0 %249 }
 0x253   :  { %v254_v62 = vpop.permute.xlu1 %253 }
 0x254   :  { %v257_v63 = vsel %vm256_vm2, %v250_v61, %v254_v62 }
 0x255   :  { %1485 = vtanh.f32 %v257_v63 }
 0x25f   :  { %v1486_v0 = vpop.eup %1485 }
 0x260   :  { %264 = vrot.lane.b32.xlu1 %v1486_v0, %s1612_s3  ;;  %260 = vrot.lane.b32.xlu0 %v1486_v0, %s1616_s27 }
 0x2d2   :  { %v265_v1 = vpop.permute.xlu1 %264  ;;  %v261_v2 = vpop.permute.xlu0 %260 }
 0x2d3   :  { %v267_v3 = vmul.f32 %v1484_v52, %v265_v1  ;;  %v263_v4 = vmul.f32 %v1482_v49, %v261_v2 }
 0x2d5   :  { %274 = vrot.lane.b32.xlu1 %v267_v3, %s1617_s28  ;;  %269 = vrot.lane.b32.xlu0 %v263_v4, %s1618_s29 }
 0x347   :  { %v275_v5 = vpop.permute.xlu1 %274  ;;  %v270_v6 = vpop.permute.xlu0 %269 }
 0x348   :  { %279 = vst.msk [vmem:[#allocation3 + $0x38] sm:$0xff] %vm278_vm3, %v275_v5  ;;  %v280_v7 = vsel %vm256_vm2, %v270_v6, %v275_v5 }
 0x349   :  { %272 = vst.msk [vmem:[#allocation3] sm:$0xff] %vm256_vm2, %v270_v6  ;;  %v285_v8 = vpack.c.bf16 %v280_v7, %v280_v7 }
 0x34b   :  { %1387 = vmatmul.mubr.msk.bf16.vlgmr.msra.gmra.mrb[8].mxu1 %vm62_vm0, %v285_v8 }
 0x34c   :  { %1399 = vmatpush3.bf16.msra.mxu1 %v1696_v13  ;;  %1402 = vmatprep.mubr.msk.bf16.mxu1 %vm1610_vm1, %v1609_v15 }
 0x34d   :  { %1400 = vmatprep.subr.bf16.mxu1 %v1609_v15 }
 0x350   :  { %1401 = vmatpush3.bf16.msra.mxu1 %v1707_v16 }
 0x351   :  { %1414 = vmatprep.subr.bf16.mxu1 %v1609_v15 }
 0x41e   :  { %v323_v9 = vpop.f32.mrb[8].mxu1 }
 0x41f   :  { %v329_v10 = vadd.f32 %v323_v9, %v1739_v32  ;;  %v330_v11 = vadd.f32 %v323_v9, %v1729_v21  ;;  %v1388_v12 = vpop.f32.mrb[9].mxu1 }
 0x420   :  { %v326_v14 = vpop.f32.mrb[10].mxu1 }
 0x421   :  { %1487 = vtanh.f32 %v329_v10  ;;  %v1389_v17 = vpop.f32.mrb[11].mxu1  ;;  %v1299_v20 = vmul.f32 -1.442695, %v329_v10  ;;  %v1300_v22 = vmul.f32 -1.442695, %v330_v11 }
 0x422   :  { %1489 = vtanh.f32 %v330_v11 }
 0x423   :  { %1491 = vpow2.f32 %v1299_v20 }
 0x424   :  { %1493 = vpow2.f32 %v1300_v22 }
 0x42b   :  { %v1488_v18 = vpop.eup %1487 }
 0x42c   :  { %v1490_v19 = vpop.eup %1489  ;;  %351 = vrot.lane.b32.xlu0 %v1488_v18, %s1612_s3 }
 0x42d   :  { %365 = vrot.lane.b32.xlu1 %v1490_v19, %s1612_s3  ;;  %v1492_v24 = vpop.eup %1491 }
 0x42e   :  { %v1494_v26 = vpop.eup %1493  ;;  %v334_v27 = vadd.f32 1.0, %v1492_v24 }
 0x42f   :  { %v340_v28 = vadd.f32 1.0, %v1494_v26 }
 0x430   :  { %346 = vrot.lane.b32.xlu0 %v257_v63, %s1613_s24  ;;  %1495 = vrcp.f32 %v334_v27 }
 0x431   :  { %360 = vrot.lane.b32.xlu1 %v257_v63, %s1615_s26  ;;  %1497 = vrcp.f32 %v340_v28 }
 0x43a   :  { %v1496_v30 = vpop.eup %1495 }
 0x43b   :  { %v1498_v36 = vpop.eup %1497 }
 0x49e   :  { %v352_v34 = vpop.permute.xlu0 %351 }
 0x49f   :  { %v366_v37 = vpop.permute.xlu1 %365  ;;  %v354_v38 = vmul.f32 %v1496_v30, %v352_v34 }
 0x4a0   :  { %v368_v39 = vmul.f32 %v1498_v36, %v366_v37 }
 0x4a1   :  { %356 = vrot.lane.b32.xlu0 %v354_v38, %s1613_s24 }
 0x4a2   :  { %370 = vrot.lane.b32.xlu1 %v368_v39, %s1613_s24  ;;  %v347_v40 = vpop.permute.xlu0 %346 }
 0x4a3   :  { %v361_v41 = vpop.permute.xlu1 %360  ;;  %v349_v42 = vmul.f32 %v1496_v30, %v347_v40 }
 0x4a4   :  { %v363_v43 = vmul.f32 %v1498_v36, %v361_v41 }
 0x513   :  { %v357_v44 = vpop.permute.xlu0 %356 }
 0x514   :  { %v371_v45 = vpop.permute.xlu1 %370  ;;  %v359_v46 = vadd.f32 %v357_v44, %v349_v42 }
 0x515   :  { %v373_v47 = vadd.f32 %v371_v45, %v363_v43 }
 0x516   :  { %375 = vrot.lane.b32.xlu0 %v359_v46, %s1614_s25 }
 0x517   :  { %379 = vrot.lane.b32.xlu1 %v373_v47, %s1615_s26 }
 0x588   :  { %v376_v48 = vpop.permute.xlu0 %375 }
 0x589   :  { %v380_v49 = vpop.permute.xlu1 %379 }
 0x58a   :  { %v382_v50 = vsel %vm256_vm2, %v376_v48, %v380_v49 }
 0x58b   :  { %1499 = vtanh.f32 %v382_v50 }
 0x595   :  { %v1500_v51 = vpop.eup %1499 }
 0x596   :  { %389 = vrot.lane.b32.xlu1 %v1500_v51, %s1612_s3  ;;  %385 = vrot.lane.b32.xlu0 %v1500_v51, %s1616_s27 }
 0x608   :  { %v390_v52 = vpop.permute.xlu1 %389  ;;  %v386_v53 = vpop.permute.xlu0 %385 }
 0x609   :  { %v392_v54 = vmul.f32 %v1498_v36, %v390_v52  ;;  %v388_v55 = vmul.f32 %v1496_v30, %v386_v53 }
 0x60b   :  { %400 = vrot.lane.b32.xlu1 %v392_v54, %s1617_s28  ;;  %394 = vrot.lane.b32.xlu0 %v388_v55, %s1618_s29 }
 0x67d   :  { %v401_v56 = vpop.permute.xlu1 %400  ;;  %v395_v57 = vpop.permute.xlu0 %394 }
 0x67e   :  { %404 = vst.msk [vmem:[#allocation3 + $0x30] sm:$0xff] %vm278_vm3, %v401_v56  ;;  %v405_v58 = vsel %vm256_vm2, %v395_v57, %v401_v56 }
 0x67f   :  { %398 = vst.msk [vmem:[#allocation3 + $0x8] sm:$0xff] %vm256_vm2, %v395_v57  ;;  %v410_v59 = vpack.c.bf16 %v405_v58, %v405_v58 }
 0x681   :  { %1395 = vmatmul.mubr.msk.bf16.vlgmr.msra.gmra.mrb[4].mxu0 %vm62_vm0, %v410_v59 }
 0x682   :  { %1407 = vmatpush3.bf16.msra.mxu0 %v1696_v13  ;;  %1410 = vmatprep.mubr.msk.bf16.mxu0 %vm1610_vm1, %v1609_v15 }
 0x683   :  { %1408 = vmatprep.subr.bf16.mxu0 %v1609_v15 }
 0x686   :  { %1409 = vmatpush3.bf16.msra.mxu0 %v1707_v16 }
 0x687   :  { %1422 = vmatprep.subr.bf16.mxu0 %v1609_v15 }
 0x754   :  { %v448_v60 = vpop.f32.mrb[4].mxu0 }
 0x755   :  { %v454_v61 = vadd.f32 %v448_v60, %v1731_v23  ;;  %v455_v62 = vadd.f32 %v448_v60, %v1737_v31  ;;  %v1396_v63 = vpop.f32.mrb[5].mxu0 }
 0x756   :  { %v451_v0 = vpop.f32.mrb[6].mxu0 }
 0x757   :  { %1501 = vtanh.f32 %v454_v61  ;;  %v1397_v1 = vpop.f32.mrb[7].mxu0  ;;  %v1302_v4 = vmul.f32 -1.442695, %v454_v61  ;;  %v1303_v5 = vmul.f32 -1.442695, %v455_v62 }
 0x758   :  { %1503 = vtanh.f32 %v455_v62 }
 0x759   :  { %1505 = vpow2.f32 %v1302_v4 }
 0x75a   :  { %1507 = vpow2.f32 %v1303_v5 }
 0x761   :  { %v1502_v2 = vpop.eup %1501 }
 0x762   :  { %v1504_v3 = vpop.eup %1503  ;;  %476 = vrot.lane.b32.xlu0 %v1502_v2, %s1612_s3 }
 0x763   :  { %490 = vrot.lane.b32.xlu1 %v1504_v3, %s1612_s3  ;;  %v1506_v6 = vpop.eup %1505 }
 0x764   :  { %v1508_v7 = vpop.eup %1507  ;;  %v459_v8 = vadd.f32 1.0, %v1506_v6 }
 0x765   :  { %v465_v9 = vadd.f32 1.0, %v1508_v7 }
 0x766   :  { %471 = vrot.lane.b32.xlu0 %v382_v50, %s1613_s24  ;;  %1509 = vrcp.f32 %v459_v8 }
 0x767   :  { %485 = vrot.lane.b32.xlu1 %v382_v50, %s1615_s26  ;;  %1511 = vrcp.f32 %v465_v9 }
 0x770   :  { %v1510_v10 = vpop.eup %1509 }
 0x771   :  { %v1512_v12 = vpop.eup %1511 }
 0x7d4   :  { %v477_v11 = vpop.permute.xlu0 %476 }
 0x7d5   :  { %v491_v14 = vpop.permute.xlu1 %490  ;;  %v479_v17 = vmul.f32 %v1510_v10, %v477_v11 }
 0x7d6   :  { %v493_v18 = vmul.f32 %v1512_v12, %v491_v14 }
 0x7d7   :  { %481 = vrot.lane.b32.xlu0 %v479_v17, %s1613_s24 }
 0x7d8   :  { %495 = vrot.lane.b32.xlu1 %v493_v18, %s1613_s24  ;;  %v472_v19 = vpop.permute.xlu0 %471 }
 0x7d9   :  { %v486_v20 = vpop.permute.xlu1 %485  ;;  %v474_v22 = vmul.f32 %v1510_v10, %v472_v19 }
 0x7da   :  { %v488_v24 = vmul.f32 %v1512_v12, %v486_v20 }
 0x849   :  { %v482_v26 = vpop.permute.xlu0 %481 }
 0x84a   :  { %v496_v27 = vpop.permute.xlu1 %495  ;;  %v484_v28 = vadd.f32 %v482_v26, %v474_v22 }
 0x84b   :  { %v498_v30 = vadd.f32 %v496_v27, %v488_v24 }
 0x84c   :  { %500 = vrot.lane.b32.xlu0 %v484_v28, %s1614_s25 }
 0x84d   :  { %504 = vrot.lane.b32.xlu1 %v498_v30, %s1615_s26 }
 0x8be   :  { %v501_v34 = vpop.permute.xlu0 %500 }
 0x8bf   :  { %v505_v36 = vpop.permute.xlu1 %504 }
 0x8c0   :  { %v507_v37 = vsel %vm256_vm2, %v501_v34, %v505_v36 }
 0x8c1   :  { %1513 = vtanh.f32 %v507_v37 }
 0x8cb   :  { %v1514_v38 = vpop.eup %1513 }
 0x8cc   :  { %514 = vrot.lane.b32.xlu1 %v1514_v38, %s1612_s3  ;;  %510 = vrot.lane.b32.xlu0 %v1514_v38, %s1616_s27 }
 0x93e   :  { %v515_v39 = vpop.permute.xlu1 %514  ;;  %v511_v40 = vpop.permute.xlu0 %510 }
 0x93f   :  { %v517_v41 = vmul.f32 %v1512_v12, %v515_v39  ;;  %v513_v42 = vmul.f32 %v1510_v10, %v511_v40 }
 0x941   :  { %525 = vrot.lane.b32.xlu1 %v517_v41, %s1617_s28  ;;  %519 = vrot.lane.b32.xlu0 %v513_v42, %s1618_s29 }
 0x9b3   :  { %v526_v43 = vpop.permute.xlu1 %525  ;;  %v520_v44 = vpop.permute.xlu0 %519 }
 0x9b4   :  { %529 = vst.msk [vmem:[#allocation3 + $0x28] sm:$0xff] %vm278_vm3, %v526_v43  ;;  %v530_v45 = vsel %vm256_vm2, %v520_v44, %v526_v43 }
 0x9b5   :  { %523 = vst.msk [vmem:[#allocation3 + $0x10] sm:$0xff] %vm256_vm2, %v520_v44  ;;  %v535_v46 = vpack.c.bf16 %v530_v45, %v530_v45 }
 0x9b7   :  { %1403 = vmatmul.mubr.msk.bf16.vlgmr.msra.gmra.mrb[12].mxu1 %vm62_vm0, %v535_v46 }
 0x9b8   :  { %1415 = vmatpush3.bf16.msra.mxu1 %v1696_v13  ;;  %1418 = vmatprep.mubr.msk.bf16.mxu1 %vm1610_vm1, %v1609_v15 }
 0x9b9   :  { %1416 = vmatprep.subr.bf16.mxu1 %v1609_v15 }
 0x9bc   :  { %1417 = vmatpush3.bf16.msra.mxu1 %v1707_v16 }
 0x9bd   :  { %1430 = vmatprep.subr.bf16.mxu1 %v1609_v15 }
 0xa8a   :  { %v573_v47 = vpop.f32.mrb[12].mxu1 }
 0xa8b   :  { %v579_v48 = vadd.f32 %v573_v47, %v1735_v29  ;;  %v580_v49 = vadd.f32 %v573_v47, %v1733_v25  ;;  %v1404_v50 = vpop.f32.mrb[13].mxu1 }
 0xa8c   :  { %v576_v51 = vpop.f32.mrb[14].mxu1 }
 0xa8d   :  { %1515 = vtanh.f32 %v579_v48  ;;  %v1405_v52 = vpop.f32.mrb[15].mxu1  ;;  %v1305_v55 = vmul.f32 -1.442695, %v579_v48  ;;  %v1306_v56 = vmul.f32 -1.442695, %v580_v49 }
 0xa8e   :  { %1517 = vtanh.f32 %v580_v49 }
 0xa8f   :  { %1519 = vpow2.f32 %v1305_v55 }
 0xa90   :  { %1521 = vpow2.f32 %v1306_v56 }
 0xa97   :  { %v1516_v53 = vpop.eup %1515 }
 0xa98   :  { %v1518_v54 = vpop.eup %1517  ;;  %601 = vrot.lane.b32.xlu0 %v1516_v53, %s1612_s3 }
 0xa99   :  { %615 = vrot.lane.b32.xlu1 %v1518_v54, %s1612_s3  ;;  %v1520_v57 = vpop.eup %1519 }
 0xa9a   :  { %v1522_v58 = vpop.eup %1521  ;;  %v584_v59 = vadd.f32 1.0, %v1520_v57 }
 0xa9b   :  { %v590_v60 = vadd.f32 1.0, %v1522_v58 }
 0xa9c   :  { %596 = vrot.lane.b32.xlu0 %v507_v37, %s1613_s24  ;;  %1523 = vrcp.f32 %v584_v59 }
 0xa9d   :  { %610 = vrot.lane.b32.xlu1 %v507_v37, %s1615_s26  ;;  %1525 = vrcp.f32 %v590_v60 }
 0xaa6   :  { %v1524_v61 = vpop.eup %1523 }
 0xaa7   :  { %v1526_v63 = vpop.eup %1525 }
 0xb0a   :  { %v602_v62 = vpop.permute.xlu0 %601 }
 0xb0b   :  { %v616_v0 = vpop.permute.xlu1 %615  ;;  %v604_v1 = vmul.f32 %v1524_v61, %v602_v62 }
 0xb0c   :  { %v618_v2 = vmul.f32 %v1526_v63, %v616_v0 }
 0xb0d   :  { %606 = vrot.lane.b32.xlu0 %v604_v1, %s1613_s24 }
 0xb0e   :  { %620 = vrot.lane.b32.xlu1 %v618_v2, %s1613_s24  ;;  %v597_v3 = vpop.permute.xlu0 %596 }
 0xb0f   :  { %v611_v4 = vpop.permute.xlu1 %610  ;;  %v599_v5 = vmul.f32 %v1524_v61, %v597_v3 }
 0xb10   :  { %v613_v6 = vmul.f32 %v1526_v63, %v611_v4 }
 0xb7f   :  { %v607_v7 = vpop.permute.xlu0 %606 }
 0xb80   :  { %v621_v8 = vpop.permute.xlu1 %620  ;;  %v609_v9 = vadd.f32 %v607_v7, %v599_v5 }
 0xb81   :  { %v623_v10 = vadd.f32 %v621_v8, %v613_v6 }
 0xb82   :  { %625 = vrot.lane.b32.xlu0 %v609_v9, %s1614_s25 }
 0xb83   :  { %629 = vrot.lane.b32.xlu1 %v623_v10, %s1615_s26 }
 0xbf4   :  { %v626_v11 = vpop.permute.xlu0 %625 }
 0xbf5   :  { %v630_v12 = vpop.permute.xlu1 %629 }
 0xbf6   :  { %v632_v14 = vsel %vm256_vm2, %v626_v11, %v630_v12 }
 0xbf7   :  { %1527 = vtanh.f32 %v632_v14 }
 0xc01   :  { %v1528_v17 = vpop.eup %1527 }
 0xc02   :  { %639 = vrot.lane.b32.xlu1 %v1528_v17, %s1612_s3  ;;  %635 = vrot.lane.b32.xlu0 %v1528_v17, %s1616_s27 }
 0xc74   :  { %v640_v18 = vpop.permute.xlu1 %639  ;;  %v636_v19 = vpop.permute.xlu0 %635 }
 0xc75   :  { %v642_v20 = vmul.f32 %v1526_v63, %v640_v18  ;;  %v638_v22 = vmul.f32 %v1524_v61, %v636_v19 }
 0xc77   :  { %650 = vrot.lane.b32.xlu1 %v642_v20, %s1617_s28  ;;  %644 = vrot.lane.b32.xlu0 %v638_v22, %s1618_s29 }
 0xce9   :  { %v651_v24 = vpop.permute.xlu1 %650  ;;  %v645_v26 = vpop.permute.xlu0 %644 }
 0xcea   :  { %654 = vst.msk [vmem:[#allocation3 + $0x20] sm:$0xff] %vm278_vm3, %v651_v24  ;;  %v655_v27 = vsel %vm256_vm2, %v645_v26, %v651_v24 }
 0xceb   :  { %648 = vst.msk [vmem:[#allocation3 + $0x18] sm:$0xff] %vm256_vm2, %v645_v26  ;;  %v658_v28 = vpack.c.bf16 %v655_v27, %v655_v27 }
 0xced   :  { %1411 = vmatmul.mubr.msk.bf16.vlgmr.msra.gmra.mrb[8].mxu0 %vm62_vm0, %v658_v28 }
 0xcee   :  { %1423 = vmatpush3.bf16.msra.mxu0 %v1696_v13  ;;  %1426 = vmatprep.mubr.msk.bf16.mxu0 %vm1610_vm1, %v1609_v15 }
 0xcef   :  { %1424 = vmatprep.subr.bf16.mxu0 %v1609_v15 }
 0xcf2   :  { %1425 = vmatpush3.bf16.msra.mxu0 %v1707_v16 }
 0xdc0   :  { %v696_v30 = vpop.f32.mrb[8].mxu0 }
 0xdc1   :  { %v702_v34 = vadd.f32 %v696_v30, %v1733_v25  ;;  %v703_v36 = vadd.f32 %v696_v30, %v1735_v29  ;;  %v1412_v37 = vpop.f32.mrb[9].mxu0 }
 0xdc2   :  { %v699_v38 = vpop.f32.mrb[10].mxu0 }
 0xdc3   :  { %1529 = vtanh.f32 %v702_v34  ;;  %v1413_v39 = vpop.f32.mrb[11].mxu0  ;;  %v1308_v42 = vmul.f32 -1.442695, %v702_v34  ;;  %v1309_v43 = vmul.f32 -1.442695, %v703_v36 }
 0xdc4   :  { %1531 = vtanh.f32 %v703_v36 }
 0xdc5   :  { %1533 = vpow2.f32 %v1308_v42 }
 0xdc6   :  { %1535 = vpow2.f32 %v1309_v43 }
 0xdcd   :  { %v1530_v40 = vpop.eup %1529 }
 0xdce   :  { %v1532_v41 = vpop.eup %1531  ;;  %724 = vrot.lane.b32.xlu0 %v1530_v40, %s1612_s3 }
 0xdcf   :  { %738 = vrot.lane.b32.xlu1 %v1532_v41, %s1612_s3  ;;  %v1534_v25 = vpop.eup %1533 }
 0xdd0   :  { %v1536_v29 = vpop.eup %1535  ;;  %v707_v44 = vadd.f32 1.0, %v1534_v25 }
 0xdd1   :  { %v713_v45 = vadd.f32 1.0, %v1536_v29 }
 0xdd2   :  { %719 = vrot.lane.b32.xlu0 %v632_v14, %s1613_s24  ;;  %1537 = vrcp.f32 %v707_v44 }
 0xdd3   :  { %733 = vrot.lane.b32.xlu1 %v632_v14, %s1615_s26  ;;  %1539 = vrcp.f32 %v713_v45 }
 0xddc   :  { %v1538_v46 = vpop.eup %1537 }
 0xddd   :  { %v1540_v48 = vpop.eup %1539 }
 0xe40   :  { %v725_v47 = vpop.permute.xlu0 %724 }
 0xe41   :  { %v739_v49 = vpop.permute.xlu1 %738  ;;  %v727_v50 = vmul.f32 %v1538_v46, %v725_v47 }
 0xe42   :  { %v741_v51 = vmul.f32 %v1540_v48, %v739_v49 }
 0xe43   :  { %729 = vrot.lane.b32.xlu0 %v727_v50, %s1613_s24 }
 0xe44   :  { %743 = vrot.lane.b32.xlu1 %v741_v51, %s1613_s24  ;;  %v720_v52 = vpop.permute.xlu0 %719 }
 0xe45   :  { %v734_v53 = vpop.permute.xlu1 %733  ;;  %v722_v54 = vmul.f32 %v1538_v46, %v720_v52 }
 0xe46   :  { %v736_v55 = vmul.f32 %v1540_v48, %v734_v53 }
 0xeb5   :  { %v730_v56 = vpop.permute.xlu0 %729 }
 0xeb6   :  { %v744_v57 = vpop.permute.xlu1 %743  ;;  %v732_v58 = vadd.f32 %v730_v56, %v722_v54 }
 0xeb7   :  { %v746_v59 = vadd.f32 %v744_v57, %v736_v55 }
 0xeb8   :  { %748 = vrot.lane.b32.xlu0 %v732_v58, %s1614_s25 }
 0xeb9   :  { %752 = vrot.lane.b32.xlu1 %v746_v59, %s1615_s26 }
 0xf2a   :  { %v749_v60 = vpop.permute.xlu0 %748 }
 0xf2b   :  { %v753_v61 = vpop.permute.xlu1 %752 }
 0xf2c   :  { %v755_v62 = vsel %vm256_vm2, %v749_v60, %v753_v61 }
 0xf2d   :  { %1541 = vtanh.f32 %v755_v62 }
 0xf37   :  { %v1542_v63 = vpop.eup %1541 }
 0xf38   :  { %762 = vrot.lane.b32.xlu1 %v1542_v63, %s1612_s3  ;;  %758 = vrot.lane.b32.xlu0 %v1542_v63, %s1616_s27 }
 0xfaa   :  { %v763_v0 = vpop.permute.xlu1 %762  ;;  %v759_v1 = vpop.permute.xlu0 %758 }
 0xfab   :  { %v765_v2 = vmul.f32 %v1540_v48, %v763_v0  ;;  %v761_v3 = vmul.f32 %v1538_v46, %v759_v1 }
 0xfad   :  { %772 = vrot.lane.b32.xlu1 %v765_v2, %s1617_s28  ;;  %767 = vrot.lane.b32.xlu0 %v761_v3, %s1618_s29 }
0x101f   :  { %v773_v4 = vpop.permute.xlu1 %772  ;;  %v768_v5 = vpop.permute.xlu0 %767 }
0x1020   :  { %775 = vst.msk [vmem:[#allocation3 + $0x18] sm:$0xff] %vm278_vm3, %v773_v4  ;;  %v776_v6 = vsel %vm256_vm2, %v768_v5, %v773_v4 }
0x1021   :  { %770 = vst.msk [vmem:[#allocation3 + $0x20] sm:$0xff] %vm256_vm2, %v768_v5  ;;  %v779_v7 = vpack.c.bf16 %v776_v6, %v776_v6 }
0x1023   :  { %1419 = vmatmul.mubr.msk.bf16.vlgmr.msra.gmra.mrb[16].mxu1 %vm62_vm0, %v779_v7 }
0x1024   :  { %1431 = vmatpush3.bf16.msra.mxu1 %v1696_v13  ;;  %1434 = vmatprep.mubr.msk.bf16.mxu1 %vm1610_vm1, %v1609_v15 }
0x1025   :  { %1432 = vmatprep.subr.bf16.mxu1 %v1609_v15 }
0x1028   :  { %1433 = vmatpush3.bf16.msra.mxu1 %v1707_v16 }
0x10f6   :  { %v817_v8 = vpop.f32.mrb[16].mxu1 }
0x10f7   :  { %v823_v9 = vadd.f32 %v817_v8, %v1737_v31  ;;  %v824_v10 = vadd.f32 %v817_v8, %v1731_v23  ;;  %v1420_v11 = vpop.f32.mrb[17].mxu1 }
0x10f8   :  { %v820_v12 = vpop.f32.mrb[18].mxu1 }
0x10f9   :  { %1543 = vtanh.f32 %v823_v9  ;;  %v1421_v14 = vpop.f32.mrb[19].mxu1  ;;  %v1311_v13 = vmul.f32 -1.442695, %v823_v9  ;;  %v1312_v15 = vmul.f32 -1.442695, %v824_v10 }
0x10fa   :  { %1545 = vtanh.f32 %v824_v10 }
0x10fb   :  { %1547 = vpow2.f32 %v1311_v13 }
0x10fc   :  { %1549 = vpow2.f32 %v1312_v15 }
0x1103   :  { %v1544_v17 = vpop.eup %1543 }
0x1104   :  { %v1546_v18 = vpop.eup %1545  ;;  %845 = vrot.lane.b32.xlu0 %v1544_v17, %s1612_s3 }
0x1105   :  { %859 = vrot.lane.b32.xlu1 %v1546_v18, %s1612_s3  ;;  %v1548_v16 = vpop.eup %1547 }
0x1106   :  { %v1550_v23 = vpop.eup %1549  ;;  %v828_v31 = vadd.f32 1.0, %v1548_v16 }
0x1107   :  { %v834_v19 = vadd.f32 1.0, %v1550_v23 }
0x1108   :  { %840 = vrot.lane.b32.xlu0 %v755_v62, %s1613_s24  ;;  %1551 = vrcp.f32 %v828_v31 }
0x1109   :  { %854 = vrot.lane.b32.xlu1 %v755_v62, %s1615_s26  ;;  %1553 = vrcp.f32 %v834_v19 }
0x1112   :  { %v1552_v20 = vpop.eup %1551 }
0x1113   :  { %v1554_v24 = vpop.eup %1553 }
0x1176   :  { %v846_v22 = vpop.permute.xlu0 %845 }
0x1177   :  { %v860_v26 = vpop.permute.xlu1 %859  ;;  %v848_v27 = vmul.f32 %v1552_v20, %v846_v22 }
0x1178   :  { %v862_v28 = vmul.f32 %v1554_v24, %v860_v26 }
0x1179   :  { %850 = vrot.lane.b32.xlu0 %v848_v27, %s1613_s24 }
0x117a   :  { %864 = vrot.lane.b32.xlu1 %v862_v28, %s1613_s24  ;;  %v841_v30 = vpop.permute.xlu0 %840 }
0x117b   :  { %v855_v34 = vpop.permute.xlu1 %854  ;;  %v843_v36 = vmul.f32 %v1552_v20, %v841_v30 }
0x117c   :  { %v857_v37 = vmul.f32 %v1554_v24, %v855_v34 }
0x11eb   :  { %v851_v38 = vpop.permute.xlu0 %850 }
0x11ec   :  { %v865_v39 = vpop.permute.xlu1 %864  ;;  %v853_v40 = vadd.f32 %v851_v38, %v843_v36 }
0x11ed   :  { %v867_v41 = vadd.f32 %v865_v39, %v857_v37 }
0x11ee   :  { %869 = vrot.lane.b32.xlu0 %v853_v40, %s1614_s25 }
0x11ef   :  { %873 = vrot.lane.b32.xlu1 %v867_v41, %s1615_s26 }
0x1260   :  { %v870_v42 = vpop.permute.xlu0 %869 }
0x1261   :  { %v874_v43 = vpop.permute.xlu1 %873 }
0x1262   :  { %v876_v25 = vsel %vm256_vm2, %v870_v42, %v874_v43 }
0x1263   :  { %1555 = vtanh.f32 %v876_v25 }
0x126d   :  { %v1556_v29 = vpop.eup %1555 }
0x126e   :  { %883 = vrot.lane.b32.xlu1 %v1556_v29, %s1612_s3  ;;  %879 = vrot.lane.b32.xlu0 %v1556_v29, %s1616_s27 }
0x12e0   :  { %v884_v44 = vpop.permute.xlu1 %883  ;;  %v880_v45 = vpop.permute.xlu0 %879 }
0x12e1   :  { %v886_v46 = vmul.f32 %v1554_v24, %v884_v44  ;;  %v882_v47 = vmul.f32 %v1552_v20, %v880_v45 }
0x12e3   :  { %893 = vrot.lane.b32.xlu1 %v886_v46, %s1617_s28  ;;  %888 = vrot.lane.b32.xlu0 %v882_v47, %s1618_s29 }
0x1355   :  { %v894_v48 = vpop.permute.xlu1 %893  ;;  %v889_v49 = vpop.permute.xlu0 %888 }
0x1356   :  { %896 = vst.msk [vmem:[#allocation3 + $0x10] sm:$0xff] %vm278_vm3, %v894_v48  ;;  %v897_v50 = vsel %vm256_vm2, %v889_v49, %v894_v48 }
0x1357   :  { %891 = vst.msk [vmem:[#allocation3 + $0x28] sm:$0xff] %vm256_vm2, %v889_v49  ;;  %v900_v51 = vpack.c.bf16 %v897_v50, %v897_v50 }
0x1359   :  { %1427 = vmatmul.mubr.msk.bf16.vlgmr.msra.gmra.mrb[12].mxu0 %vm62_vm0, %v900_v51 }
0x142c   :  { %v938_v52 = vpop.f32.mrb[12].mxu0 }
0x142d   :  { %v944_v53 = vadd.f32 %v938_v52, %v1729_v21  ;;  %v945_v54 = vadd.f32 %v938_v52, %v1739_v32  ;;  %v1428_v55 = vpop.f32.mrb[13].mxu0 }
0x142e   :  { %v941_v56 = vpop.f32.mrb[14].mxu0 }
0x142f   :  { %1557 = vtanh.f32 %v944_v53  ;;  %v1429_v57 = vpop.f32.mrb[15].mxu0  ;;  %v1314_v60 = vmul.f32 -1.442695, %v944_v53  ;;  %v1315_v61 = vmul.f32 -1.442695, %v945_v54 }
0x1430   :  { %1559 = vtanh.f32 %v945_v54 }
0x1431   :  { %1561 = vpow2.f32 %v1314_v60  ;;  %v1471_v60 = vld [vmem:[%s1974_s4] sm:$0xff]  }
0x1432   :  { %1563 = vpow2.f32 %v1315_v61  ;;  %v1472_v61 = vld [vmem:[%s1974_s4 + $0x8] sm:$0xff]   ;;  %1438 = vmatprep.subr.bf16.mxu0 %v1471_v60  ;;  %s1619_s4 = smov [#allocation3]  }
0x1433   :  { %1439 = vmatpush3.bf16.msra.mxu0 %v1471_v60  ;;  %s1272_s11 = sshll.u32 %s1619_s4, 4  ;;  %s1273_s11 = int_to_ptr.vmem [resolvable:$true] %s1272_s11 }
0x1434   :  { %1440 = vmatprep.subr.bf16.mxu0 %v1472_v61  ;;  %s1585_s1 = scalar_lea.vmem %s1273_s11, 1024  ;;  %p1590_p1 = scmp.lt.s32.totalorder %s1273_s11, %s1273_s11 }
0x1435   :  { %p1586_p0 = scmp.ne.s32.totalorder %s1273_s11, %s1585_s1  ;;  %p1591_p2 = scmp.lt.s32.totalorder %s1585_s1, %s1585_s1 }
0x1437   :  { %1441 = vmatpush3.bf16.msra.mxu0 %v1472_v61  ;;  %p1592_p3 = por %p1591_p2, %p1590_p1 }
0x1439   :  { %v1558_v58 = vpop.eup %1557  ;;  %p1593_p4 = pnand %p1592_p3, %p1586_p0 }
0x143a   :  { %v1560_v59 = vpop.eup %1559  ;;  %966 = vrot.lane.b32.xlu0 %v1558_v58, %s1612_s3 }
0x143b   :  { %980 = vrot.lane.b32.xlu1 %v1560_v59, %s1612_s3  ;;  %v1562_v21 = vpop.eup %1561 }
0x143c   :  { %v1564_v32 = vpop.eup %1563  ;;  %v949_v62 = vadd.f32 1.0, %v1562_v21 }
0x143d   :  { %v955_v63 = vadd.f32 1.0, %v1564_v32 }
0x143e   :  { %961 = vrot.lane.b32.xlu0 %v876_v25, %s1613_s24  ;;  %1565 = vrcp.f32 %v949_v62 }
0x143f   :  { %975 = vrot.lane.b32.xlu1 %v876_v25, %s1615_s26  ;;  %1567 = vrcp.f32 %v955_v63 }
0x1448   :  { %v1566_v0 = vpop.eup %1565 }
0x1449   :  { %v1568_v2 = vpop.eup %1567 }
0x14ac   :  { %v967_v1 = vpop.permute.xlu0 %966 }
0x14ad   :  { %v981_v3 = vpop.permute.xlu1 %980  ;;  %v969_v4 = vmul.f32 %v1566_v0, %v967_v1 }
0x14ae   :  { %v983_v5 = vmul.f32 %v1568_v2, %v981_v3 }
0x14af   :  { %971 = vrot.lane.b32.xlu0 %v969_v4, %s1613_s24  ;;  %v1144_v4 = vld [vmem:[#allocation3 + $0x28] sm:$0xff] }
0x14b0   :  { %985 = vrot.lane.b32.xlu1 %v983_v5, %s1613_s24  ;;  %v962_v6 = vpop.permute.xlu0 %961  ;;  %v1142_v5 = vld [vmem:[#allocation3 + $0x18] sm:$0xff] }
0x14b1   :  { %v976_v7 = vpop.permute.xlu1 %975  ;;  %v964_v8 = vmul.f32 %v1566_v0, %v962_v6 }
0x14b2   :  { %v978_v9 = vmul.f32 %v1568_v2, %v976_v7 }
0x1521   :  { %v972_v10 = vpop.permute.xlu0 %971 }
0x1522   :  { %v986_v11 = vpop.permute.xlu1 %985  ;;  %v974_v12 = vadd.f32 %v972_v10, %v964_v8  ;;  %v1143_v8 = vld [vmem:[#allocation3 + $0x20] sm:$0xff] }
0x1523   :  { %v988_v14 = vadd.f32 %v986_v11, %v978_v9  ;;  %v1152_v11 = vmax.f32 %v1144_v4, 0.0 }
0x1524   :  { %990 = vrot.lane.b32.xlu0 %v974_v12, %s1614_s25  ;;  %v1150_v12 = vmax.f32 %v1142_v5, 0.0 }
0x1525   :  { %994 = vrot.lane.b32.xlu1 %v988_v14, %s1615_s26 }
0x1596   :  { %v991_v17 = vpop.permute.xlu0 %990 }
0x1597   :  { %v995_v18 = vpop.permute.xlu1 %994 }
0x1598   :  { %v997_v13 = vsel %vm256_vm2, %v991_v17, %v995_v18  ;;  %v1151_v17 = vmax.f32 %v1143_v8, 0.0 }
0x1599   :  { %1569 = vtanh.f32 %v997_v13 }
0x15a3   :  { %v1570_v15 = vpop.eup %1569 }
0x15a4   :  { %1004 = vrot.lane.b32.xlu1 %v1570_v15, %s1612_s3  ;;  %1000 = vrot.lane.b32.xlu0 %v1570_v15, %s1616_s27 }
0x1616   :  { %v1005_v16 = vpop.permute.xlu1 %1004  ;;  %v1001_v23 = vpop.permute.xlu0 %1000 }
0x1617   :  { %v1007_v31 = vmul.f32 %v1568_v2, %v1005_v16  ;;  %v1003_v19 = vmul.f32 %v1566_v0, %v1001_v23  ;;  %v1141_v2 = vld [vmem:[#allocation3 + $0x10] sm:$0xff] }
0x1618   :  { %v1149_v7 = vmax.f32 %v1141_v2, 0.0 }
0x1619   :  { %1014 = vrot.lane.b32.xlu1 %v1007_v31, %s1617_s28  ;;  %1009 = vrot.lane.b32.xlu0 %v1003_v19, %s1618_s29 }
0x161a   :  { %v1156_v18 = vpack.c.bf16 %v1150_v12, %v1149_v7 }
0x168b   :  { %v1015_v20 = vpop.permute.xlu1 %1014  ;;  %v1010_v22 = vpop.permute.xlu0 %1009 }
0x168c   :  { %1017 = vst.msk [vmem:[#allocation3 + $0x8] sm:$0xff] %vm278_vm3, %v1015_v20  ;;  %v1018_v24 = vsel %vm256_vm2, %v1010_v22, %v1015_v20 }
0x168d   :  { %1012 = vst.msk [vmem:[#allocation3 + $0x30] sm:$0xff] %vm256_vm2, %v1010_v22  ;;  %v1021_v26 = vpack.c.bf16 %v1018_v24, %v1018_v24 }
0x168f   :  { %1435 = vmatmul.mubr.msk.bf16.vlgmr.msra.gmra.mrb[20].mxu1 %vm62_vm0, %v1021_v26 }
0x1693   :  { %v1140_v3 = vld [vmem:[#allocation3 + $0x8] sm:$0xff] }
0x1694   :  { %v1148_v10 = vmax.f32 %v1140_v3, 0.0  ;;  %v1145_v16 = vld [vmem:[#allocation3 + $0x30] sm:$0xff] }
0x1695   :  { %v1153_v31 = vmax.f32 %v1145_v16, 0.0 }
0x1762   :  { %v1059_v27 = vpop.f32.mrb[20].mxu1 }
0x1763   :  { %v1065_v28 = vadd.f32 %v1059_v27, %v1743_v35  ;;  %v1066_v30 = vadd.f32 %v1059_v27, %v1741_v33  ;;  %v1436_v34 = vpop.f32.mrb[21].mxu1 }
0x1764   :  { %v1062_v36 = vpop.f32.mrb[22].mxu1 }
0x1765   :  { %1571 = vtanh.f32 %v1065_v28  ;;  %v1437_v37 = vpop.f32.mrb[23].mxu1  ;;  %v1317_v40 = vmul.f32 -1.442695, %v1065_v28  ;;  %v1318_v41 = vmul.f32 -1.442695, %v1066_v30 }
0x1766   :  { %1573 = vtanh.f32 %v1066_v30 }
0x1767   :  { %1575 = vpow2.f32 %v1317_v40 }
0x1768   :  { %1577 = vpow2.f32 %v1318_v41 }
0x176f   :  { %v1572_v38 = vpop.eup %1571 }
0x1770   :  { %v1574_v39 = vpop.eup %1573  ;;  %1087 = vrot.lane.b32.xlu0 %v1572_v38, %s1612_s3 }
0x1771   :  { %1101 = vrot.lane.b32.xlu1 %v1574_v39, %s1612_s3  ;;  %v1576_v33 = vpop.eup %1575 }
0x1772   :  { %v1578_v35 = vpop.eup %1577  ;;  %v1070_v42 = vadd.f32 1.0, %v1576_v33 }
0x1773   :  { %v1076_v43 = vadd.f32 1.0, %v1578_v35 }
0x1774   :  { %1082 = vrot.lane.b32.xlu0 %v997_v13, %s1613_s24  ;;  %1579 = vrcp.f32 %v1070_v42 }
0x1775   :  { %1096 = vrot.lane.b32.xlu1 %v997_v13, %s1615_s26  ;;  %1581 = vrcp.f32 %v1076_v43  ;;  %v1157_v13 = vpack.c.bf16 %v1152_v11, %v1151_v17 }
0x177e   :  { %v1580_v25 = vpop.eup %1579 }
0x177f   :  { %v1582_v44 = vpop.eup %1581 }
0x17e2   :  { %v1088_v29 = vpop.permute.xlu0 %1087 }
0x17e3   :  { %v1102_v45 = vpop.permute.xlu1 %1101  ;;  %v1090_v46 = vmul.f32 %v1580_v25, %v1088_v29 }
0x17e4   :  { %v1104_v47 = vmul.f32 %v1582_v44, %v1102_v45 }
0x17e5   :  { %1092 = vrot.lane.b32.xlu0 %v1090_v46, %s1613_s24 }
0x17e6   :  { %1106 = vrot.lane.b32.xlu1 %v1104_v47, %s1613_s24  ;;  %v1083_v48 = vpop.permute.xlu0 %1082 }
0x17e7   :  { %v1097_v49 = vpop.permute.xlu1 %1096  ;;  %v1085_v50 = vmul.f32 %v1580_v25, %v1083_v48 }
0x17e8   :  { %v1099_v51 = vmul.f32 %v1582_v44, %v1097_v49 }
0x1857   :  { %v1093_v52 = vpop.permute.xlu0 %1092 }
0x1858   :  { %v1107_v53 = vpop.permute.xlu1 %1106  ;;  %v1095_v54 = vadd.f32 %v1093_v52, %v1085_v50 }
0x1859   :  { %v1109_v55 = vadd.f32 %v1107_v53, %v1099_v51 }
0x185a   :  { %1111 = vrot.lane.b32.xlu0 %v1095_v54, %s1614_s25 }
0x185b   :  { %1115 = vrot.lane.b32.xlu1 %v1109_v55, %s1615_s26 }
0x18cc   :  { %v1112_v56 = vpop.permute.xlu0 %1111 }
0x18cd   :  { %v1116_v57 = vpop.permute.xlu1 %1115 }
0x18ce   :  { %v1118_v58 = vsel %vm256_vm2, %v1112_v56, %v1116_v57 }
0x18cf   :  { %1583 = vtanh.f32 %v1118_v58 }
0x18d9   :  { %v1584_v59 = vpop.eup %1583 }
0x18da   :  { %1121 = vrot.lane.b32.xlu1 %v1584_v59, %s1616_s27  ;;  %1125 = vrot.lane.b32.xlu0 %v1584_v59, %s1612_s3 }
0x194c   :  { %v1122_v21 = vpop.permute.xlu1 %1121  ;;  %v1126_v32 = vpop.permute.xlu0 %1125 }
0x194d   :  { %v1124_v62 = vmul.f32 %v1580_v25, %v1122_v21  ;;  %v1128_v63 = vmul.f32 %v1582_v44, %v1126_v32 }
0x194f   :  { %1130 = vrot.lane.b32.xlu1 %v1124_v62, %s1618_s29  ;;  %1135 = vrot.lane.b32.xlu0 %v1128_v63, %s1617_s28 }
0x19c1   :  { %v1131_v0 = vpop.permute.xlu1 %1130  ;;  %v1136_v1 = vpop.permute.xlu0 %1135 }
0x19c2   :  { %1133 = vst.msk [vmem:[#allocation3 + $0x38] sm:$0xff] %vm256_vm2, %v1131_v0 }
0x19c3   :  { %1138 = vst.msk [vmem:[#allocation3] sm:$0xff] %vm278_vm3, %v1136_v1 }
0x19c9   :  { %v1146_v15 = vld [vmem:[#allocation3 + $0x38] sm:$0xff] }
0x19ca   :  { %v1139_v6 = vld [vmem:[#allocation3] sm:$0xff]  ;;  %v1154_v23 = vmax.f32 %v1146_v15, 0.0 }
0x19cb   :  { %v1147_v9 = vmax.f32 %v1139_v6, 0.0 }
0x19cc   :  { %v1158_v19 = vpack.c.bf16 %v1154_v23, %v1153_v31 }
0x19cd   :  { %v1155_v14 = vpack.c.bf16 %v1148_v10, %v1147_v9 }
0x19cf   :  { %1442 = vmatprep.mubr.msk.bf16.mxu0 %vm62_vm0, %v1155_v14 }
0x19d0   :  { %1443 = vmatmul.mubr.msk.bf16.vlgmr.msra.gmra.mrb[16].mxu0 %vm62_vm0, %v1156_v18 }
0x19d1   :  { %1446 = vmatprep.mubr.msk.bf16.mxu0 %vm62_vm0, %v1157_v13 }
0x19d8   :  { %1447 = vmatmul.mubr.msk.bf16.gmra.mrb[20].mxu0 %vm62_vm0, %v1158_v19 }
0x19d9   :  { %1596 = shalt.err (!%p1593_p4)
}
0x19da   :  { %s1597_s14 = scalar_lea.hbm %s1976_s6, 1024 }
0x19db   :  { %p1598_p5 = scmp.ne.s32.totalorder %s1976_s6, %s1597_s14  ;;  %p1601_p6 = scmp.lt.u32.totalorder %s1597_s14, %s1976_s6 }
0x19dd   :  { %p1603_p7 = pnand %p1601_p6, %p1598_p5 }
0x19df   :  { %1606 = shalt.err (!%p1603_p7)
}
0x19e0   :  { %s1620_s19 = smov 128   ;;  %s1621_s20 = smov 8   ;;  %v1319_v20 = vld [vmem:[%s1975_s5] ss:$0 sm:$0xff] }
0x19e1   :  { %1278 = dma.vmem_to_hbm [thread:$0]  %s1273_s11, 1024, %s1976_s6, [#allocation4], %s1620_s19, %s1620_s19, %s1621_s20  }
0x1aa3   :  { %v1444_v22 = vpop.f32.mrb[16].mxu0 }
0x1aa4   :  { %v1237_v24 = vadd.f32 %v1444_v22, %v1319_v20  ;;  %v1228_v26 = vpop.f32.mrb[17].mxu0 }
0x1aa5   :  { %v1229_v27 = vadd.f32 %v1319_v20, %v1228_v26  ;;  %v1445_v28 = vpop.f32.mrb[18].mxu0 }
0x1aa6   :  { %1261 = vst [vmem:[%s1977_s7 + $0x10] sm:$0xff] %v1237_v24  ;;  %v1240_v30 = vadd.f32 %v1445_v28, %v1319_v20  ;;  %v1231_v34 = vpop.f32.mrb[19].mxu0 }
0x1aa7   :  { %1259 = vst [vmem:[%s1977_s7] sm:$0xff] %v1229_v27  ;;  %v1232_v36 = vadd.f32 %v1319_v20, %v1231_v34 }
0x1aa8   :  { %1262 = vst [vmem:[%s1977_s7 + $0x18] sm:$0xff] %v1240_v30 }
0x1aa9   :  { %1260 = vst [vmem:[%s1977_s7 + $0x8] sm:$0xff] %v1232_v36 }
0x1aab   :  { %v1448_v37 = vpop.f32.mrb[20].mxu0 }
0x1aac   :  { %v1253_v38 = vadd.f32 %v1448_v37, %v1319_v20  ;;  %v1244_v39 = vpop.f32.mrb[21].mxu0 }
0x1aad   :  { %v1245_v40 = vadd.f32 %v1319_v20, %v1244_v39  ;;  %v1449_v41 = vpop.f32.mrb[22].mxu0 }
0x1aae   :  { %1265 = vst [vmem:[%s1977_s7 + $0x30] sm:$0xff] %v1253_v38  ;;  %v1256_v33 = vadd.f32 %v1449_v41, %v1319_v20  ;;  %v1247_v35 = vpop.f32.mrb[23].mxu0 }
0x1aaf   :  { %1263 = vst [vmem:[%s1977_s7 + $0x20] sm:$0xff] %v1245_v40  ;;  %v1248_v42 = vadd.f32 %v1319_v20, %v1247_v35 }
0x1ab0   :  { %1266 = vst [vmem:[%s1977_s7 + $0x38] sm:$0xff] %v1256_v33 }
0x1ab1   :  { %1264 = vst [vmem:[%s1977_s7 + $0x28] sm:$0xff] %v1248_v42 }
0x1ab2   :  { %1607 = dma.done.wait [#allocation4], 1024  }
0x1ab3   :  { %1608 = vsyncadd [#allocation4], 4294966272 }
0x1ab4   :  { %1286 = vsyncpa [#allocation4], 1 }

</bundles_post_ra>
